<compile_context>
chip_gen: v5e
topology: v5e:2x2
jax: 0.10.0
libtpu: 0.0.40
codegen_flags: <defaults>
</compile_context>

<pallas_src>
import numpy as np
import jax
import jax.numpy as jnp
from jax.experimental import pallas as pl
from jax.experimental.pallas import tpu as pltpu

FEAT = 19          # 3 (v1) + 3 (v2) + 3 (disp) + 1 (len) + 9 (outer(disp, disp))
EDGE_BLOCK = 256   # edges per grid step (multiple of 128)


def edge_feat_kernel(n1_ref, n2_ref, x1_ref, x2_ref, o_ref):
    m_pad, cdim, eb = x1_ref.shape

    x1 = x1_ref[...]                       # (M, 3, EB)  cluster-1 points on leading axis
    x2 = x2_ref[...]                       # (3, M, EB)  cluster-2 points on sublane axis
    n1 = n1_ref[...]                       # (1, EB) i32 true size of cluster 1
    n2 = n2_ref[...]                       # (1, EB) i32 true size of cluster 2

    big = jnp.float32(1e30)

    # Index tensors from safe primitives: one 2-D sublane iota + constant tiles.
    iota_sub = jax.lax.broadcasted_iota(jnp.int32, (m_pad, eb), 0)         # (M, EB)
    j_idx = iota_sub[None]                                                 # (1, M, EB)
    i_idx = jnp.concatenate(
        [jnp.full((1, 1, eb), k, jnp.int32) for k in range(m_pad)], axis=0)  # (M, 1, EB)

    # ---- pairwise squared distances (difference based, pure VPU) -------------
    d2 = jnp.zeros((m_pad, m_pad, eb), jnp.float32)
    for c in range(cdim):
        diff = x1[:, c:c + 1, :] - x2[c:c + 1, :, :]       # (M,1,EB)-(1,M,EB) -> (M,M,EB)
        d2 = d2 + diff * diff

    valid = (i_idx < n1[None]) & (j_idx < n2[None])        # (M, M, EB)
    d2m = jnp.where(valid, d2, big)

    # ---- row-major flattened argmin over the (n1, n2) distance matrix --------
    rowmin = d2m[:, 0:1, :]
    for j in range(1, m_pad):
        rowmin = jnp.minimum(rowmin, d2m[:, j:j + 1, :])   # (M, 1, EB): min over j per row i
    minval = jnp.min(rowmin, axis=0, keepdims=True)        # (1, 1, EB): global min per edge

    # first row containing the min, then first column in that row attaining it
    i1 = jnp.min(jnp.where(rowmin <= minval, i_idx, m_pad),
                 axis=0, keepdims=True)                    # (1, 1, EB)
    row_i1 = jnp.min(jnp.where(i_idx == i1, d2m, big),
                     axis=0, keepdims=True)                # (1, M, EB) == d2m[i1, :, :]
    i2 = jnp.min(jnp.where(row_i1 <= minval, j_idx, m_pad),
                 axis=1, keepdims=True)                    # (1, 1, EB)

    # ---- gather the closest voxel of each cluster (masked reductions) --------
    v1 = jnp.sum(jnp.where(i_idx == i1, x1, 0.0), axis=0)  # (3, EB)  leading-axis reduce
    sel2 = (iota_sub == i2[0])                             # (M, EB)
    v2 = jnp.concatenate(
        [jnp.sum(jnp.where(sel2, x2[c], 0.0), axis=0, keepdims=True)
         for c in range(cdim)], axis=0)                    # (3, EB)

    # ---- displacement, length, direction, flattened outer product ------------
    disp = v1 - v2                                         # (3, EB)
    sumsq = jnp.sum(disp * disp, axis=0, keepdims=True)    # (1, EB)
    lend = jnp.sqrt(sumsq)                                 # (1, EB)
    inv = pl.reciprocal(jnp.where(lend > 0.0, lend, 1.0), approx=False)   # EUP
    dispn = disp * inv                                     # (3, EB); stays 0 if lend == 0

    b0 = dispn[0:1] * dispn                                # (3, EB): d0*[d0,d1,d2]
    b1 = dispn[1:2] * dispn
    b2 = dispn[2:3] * dispn

    # ---- single lane-dense store of the (19, EB) feature slab ----------------
    o_ref[...] = jnp.concatenate([v1, v2, dispn, lend, b0, b1, b2], axis=0)


def cluster_edge_features_pallas(vox, idx1, idx2, n1, n2, *, edge_block=EDGE_BLOCK):
    """vox: (N, 3) f32; idx1/idx2: (E, M_PAD) i32; n1/n2: (E,) i32 -> (E, FEAT) f32."""
    E, m_pad = idx1.shape
    e_pad = pl.cdiv(E, edge_block) * edge_block
    pad = e_pad - E

    idx1 = jnp.pad(idx1, ((0, pad), (0, 0)))
    idx2 = jnp.pad(idx2, ((0, pad), (0, 0)))
    n1p = jnp.pad(n1, (0, pad)).reshape(1, e_pad).astype(jnp.int32)
    n2p = jnp.pad(n2, (0, pad)).reshape(1, e_pad).astype(jnp.int32)

    # Edge gather of cluster voxels (XLA glue), laid out edges-on-lanes.
    # TODO(synk): for very large E / cluster sizes, move this gather into the kernel
    # (scalar-prefetched indices + manual DMA) instead of materializing it in HBM.
    vox_f = vox.astype(jnp.float32)
    x1g = jnp.transpose(vox_f[idx1], (1, 2, 0))            # (M_PAD, 3, E_PAD)
    x2g = jnp.transpose(vox_f[idx2], (2, 1, 0))            # (3, M_PAD, E_PAD)

    grid_spec = pltpu.PrefetchScalarGridSpec(
        num_scalar_prefetch=0,
        grid=(e_pad // edge_block,),
        in_specs=[
            pl.BlockSpec((1, edge_block), lambda e: (0, e)),
            pl.BlockSpec((1, edge_block), lambda e: (0, e)),
            pl.BlockSpec((m_pad, 3, edge_block), lambda e: (0, 0, e)),
            pl.BlockSpec((3, m_pad, edge_block), lambda e: (0, 0, e)),
        ],
        out_specs=pl.BlockSpec((FEAT, edge_block), lambda e: (0, e)),
    )
    out = pl.pallas_call(
        edge_feat_kernel,
        out_shape=jax.ShapeDtypeStruct((FEAT, e_pad), jnp.float32),
        grid_spec=grid_spec,
        compiler_params=pltpu.CompilerParams(dimension_semantics=("parallel",)),
    )(n1p, n2p, x1g, x2g)

    return out[:, :E].T                                    # (E, 19), torch feature order


def _padded_cluster_table(clusts):
    """Ragged cluster list -> (C, M_PAD) index table + (C,) sizes (host prep, O(C))."""
    lens = np.asarray([len(c) for c in clusts], dtype=np.int32)
    m_pad = max(8, int(-(-int(lens.max()) // 8) * 8))      # round up to a multiple of 8
    tab = np.zeros((len(clusts), m_pad), dtype=np.int32)
    for i, c in enumerate(clusts):
        tab[i, :len(c)] = np.asarray(c, dtype=np.int32)
    return tab, lens


def clust_geo_edge_encoder_forward(data, clusts, edge_index):
    """JAX/Pallas equivalent of ClustGeoEdgeEncoder.forward (use_numpy path produces the
    same features, so only one path is implemented)."""
    ei = np.asarray(edge_index)
    half = ei.shape[1] // 2
    undirected = (ei.shape[1] % 2 == 0) and \
        [int(ei[1, 0]), int(ei[0, 0])] == [int(ei[0, half]), int(ei[1, half])]
    if undirected:
        ei = ei[:, :half]

    # Vectorized per-edge index construction (no per-edge Python loop).
    tab, lens = _padded_cluster_table(clusts)
    src = ei[0].astype(np.int64)
    dst = ei[1].astype(np.int64)
    idx1, n1 = tab[src], lens[src]
    idx2, n2 = tab[dst], lens[dst]

    vox = jnp.asarray(data)[:, :3].astype(jnp.float32)
    feats = cluster_edge_features_pallas(
        vox, jnp.asarray(idx1), jnp.asarray(idx2), jnp.asarray(n1), jnp.asarray(n2))

    if undirected:
        feats_flip = jnp.concatenate(
            [feats[:, 3:6], feats[:, 0:3], -feats[:, 6:9], feats[:, 9:]], axis=1)
        feats = jnp.concatenate([feats, feats_flip], axis=0)
    return feats


def ref_forward(data_np, clusts, edge_index_np):
    """Pure NumPy reference mirroring the PyTorch forward."""
    voxels = data_np[:, :3].astype(np.float32)
    ei = np.asarray(edge_index_np)
    half = ei.shape[1] // 2
    undirected = (ei.shape[1] % 2 == 0) and \
        [int(ei[1, 0]), int(ei[0, 0])] == [int(ei[0, half]), int(ei[1, half])]
    if undirected:
        ei = ei[:, :half]
    feats = []
    for e in ei.T:
        x1 = voxels[np.asarray(clusts[int(e[0])])]
        x2 = voxels[np.asarray(clusts[int(e[1])])]
        d12 = np.linalg.norm(x1[:, None, :] - x2[None, :, :], axis=-1)
        imin = int(np.argmin(d12))
        i1, i2 = imin // len(x2), imin % len(x2)
        v1 = x1[i1, :]
        v2 = x2[i2, :]
        disp = v1 - v2
        lend = np.linalg.norm(disp)
        if lend > 0:
            disp = disp / lend
        B = np.outer(disp, disp).flatten()
        feats.append(np.concatenate([v1, v2, disp, [lend], B]).astype(np.float32))
    feats = np.stack(feats, axis=0)
    if undirected:
        ff = feats.copy()
        ff[:, :3] = feats[:, 3:6]
        ff[:, 3:6] = feats[:, :3]
        ff[:, 6:9] = -feats[:, 6:9]
        feats = np.concatenate([feats, ff], axis=0)
    return feats


if __name__ == "__main__":
    key = jax.random.PRNGKey(0)
    N = 16
    data = jax.random.uniform(key, (N, 5), jnp.float32, 0.0, 10.0)   # (x, y, z, batch, value)

    # 3 disjoint ragged clusters of voxel indices (deterministic).
    perm = np.random.RandomState(0).permutation(N)
    clusts = [perm[:5].astype(np.int32),
              perm[5:12].astype(np.int32),
              perm[12:16].astype(np.int32)]

    # Undirected edge index: forward edges followed by their reverses.
    e_half = np.array([[0, 1, 0],
                       [1, 2, 2]], dtype=np.int64)
    edge_index = np.concatenate([e_half, e_half[::-1]], axis=1)      # (2, 6)

    feats = clust_geo_edge_encoder_forward(data, clusts, edge_index)
    feats = jax.block_until_ready(feats)

    ref = ref_forward(np.asarray(data), clusts, edge_index)
    assert feats.shape == ref.shape, (feats.shape, ref.shape)
    np.testing.assert_allclose(np.asarray(feats), ref, rtol=1e-5, atol=1e-5)
    print("KERNEL_OK")
</pallas_src>

<mosaic_0001>
module attributes {stable_mosaic.version = 11 : i64} {
  func.func @edge_feat_kernel(%arg0: i32, %arg1: memref<1x256xi32, #tpu.memory_space<vmem>>, %arg2: memref<1x256xi32, #tpu.memory_space<vmem>>, %arg3: memref<8x3x256xf32, #tpu.memory_space<vmem>>, %arg4: memref<3x8x256xf32, #tpu.memory_space<vmem>>, %arg5: memref<19x256xf32, #tpu.memory_space<vmem>>) attributes {dimension_semantics = [#tpu.dimension_semantics<parallel>], iteration_bounds = array<i64: 1>, scalar_prefetch = 0 : i64, scratch_operands = 0 : i64, tpu.core_type = #tpu.core_type<tc>, window_params = [{transform_indices = @transform_0, window_bounds = array<i64: 1, 256>}, {transform_indices = @transform_1, window_bounds = array<i64: 1, 256>}, {transform_indices = @transform_2, window_bounds = array<i64: 8, 3, 256>}, {transform_indices = @transform_3, window_bounds = array<i64: 3, 8, 256>}, {transform_indices = @transform_4, window_bounds = array<i64: 19, 256>}]} {
    %c0 = arith.constant 0 : index
    %c0_0 = arith.constant 0 : index
    %c0_1 = arith.constant 0 : index
    %0 = vector.load %arg3[%c0, %c0_0, %c0_1] : memref<8x3x256xf32, #tpu.memory_space<vmem>>, vector<8x3x256xf32>
    %c0_2 = arith.constant 0 : index
    %c0_3 = arith.constant 0 : index
    %c0_4 = arith.constant 0 : index
    %1 = vector.load %arg4[%c0_2, %c0_3, %c0_4] : memref<3x8x256xf32, #tpu.memory_space<vmem>>, vector<3x8x256xf32>
    %c0_5 = arith.constant 0 : index
    %c0_6 = arith.constant 0 : index
    %2 = vector.load %arg1[%c0_5, %c0_6] : memref<1x256xi32, #tpu.memory_space<vmem>>, vector<1x256xi32>
    %c0_7 = arith.constant 0 : index
    %c0_8 = arith.constant 0 : index
    %3 = vector.load %arg2[%c0_7, %c0_8] : memref<1x256xi32, #tpu.memory_space<vmem>>, vector<1x256xi32>
    %4 = tpu.iota {dimensions = array<i32: 0>} : vector<8x256xi32>
    %5 = vector.shape_cast %4 : vector<8x256xi32> to vector<1x8x256xi32>
    %c0_i32 = arith.constant 0 : i32
    %6 = vector.broadcast %c0_i32 : i32 to vector<1x1x256xi32>
    %c1_i32 = arith.constant 1 : i32
    %7 = vector.broadcast %c1_i32 : i32 to vector<1x1x256xi32>
    %c2_i32 = arith.constant 2 : i32
    %8 = vector.broadcast %c2_i32 : i32 to vector<1x1x256xi32>
    %c3_i32 = arith.constant 3 : i32
    %9 = vector.broadcast %c3_i32 : i32 to vector<1x1x256xi32>
    %c4_i32 = arith.constant 4 : i32
    %10 = vector.broadcast %c4_i32 : i32 to vector<1x1x256xi32>
    %c5_i32 = arith.constant 5 : i32
    %11 = vector.broadcast %c5_i32 : i32 to vector<1x1x256xi32>
    %c6_i32 = arith.constant 6 : i32
    %12 = vector.broadcast %c6_i32 : i32 to vector<1x1x256xi32>
    %c7_i32 = arith.constant 7 : i32
    %13 = vector.broadcast %c7_i32 : i32 to vector<1x1x256xi32>
    %14 = tpu.concatenate %6, %7, %8, %9, %10, %11, %12, %13 in 0 : vector<1x1x256xi32>, vector<1x1x256xi32>, vector<1x1x256xi32>, vector<1x1x256xi32>, vector<1x1x256xi32>, vector<1x1x256xi32>, vector<1x1x256xi32>, vector<1x1x256xi32> -> vector<8x1x256xi32>
    %cst = arith.constant 0.000000e+00 : f32
    %15 = vector.broadcast %cst : f32 to vector<8x8x256xf32>
    %16 = vector.extract_strided_slice %0 {offsets = [0, 0, 0], sizes = [8, 1, 256], strides = [1, 1, 1]} : vector<8x3x256xf32> to vector<8x1x256xf32>
    %17 = vector.extract_strided_slice %1 {offsets = [0, 0, 0], sizes = [1, 8, 256], strides = [1, 1, 1]} : vector<3x8x256xf32> to vector<1x8x256xf32>
    %18 = vector.broadcast %16 : vector<8x1x256xf32> to vector<8x8x256xf32>
    %19 = vector.broadcast %17 : vector<1x8x256xf32> to vector<8x8x256xf32>
    %20 = arith.subf %18, %19 : vector<8x8x256xf32>
    %21 = arith.mulf %20, %20 : vector<8x8x256xf32>
    %22 = arith.addf %15, %21 : vector<8x8x256xf32>
    %23 = vector.extract_strided_slice %0 {offsets = [0, 1, 0], sizes = [8, 1, 256], strides = [1, 1, 1]} : vector<8x3x256xf32> to vector<8x1x256xf32>
    %24 = vector.extract_strided_slice %1 {offsets = [1, 0, 0], sizes = [1, 8, 256], strides = [1, 1, 1]} : vector<3x8x256xf32> to vector<1x8x256xf32>
    %25 = vector.broadcast %23 : vector<8x1x256xf32> to vector<8x8x256xf32>
    %26 = vector.broadcast %24 : vector<1x8x256xf32> to vector<8x8x256xf32>
    %27 = arith.subf %25, %26 : vector<8x8x256xf32>
    %28 = arith.mulf %27, %27 : vector<8x8x256xf32>
    %29 = arith.addf %22, %28 : vector<8x8x256xf32>
    %30 = vector.extract_strided_slice %0 {offsets = [0, 2, 0], sizes = [8, 1, 256], strides = [1, 1, 1]} : vector<8x3x256xf32> to vector<8x1x256xf32>
    %31 = vector.extract_strided_slice %1 {offsets = [2, 0, 0], sizes = [1, 8, 256], strides = [1, 1, 1]} : vector<3x8x256xf32> to vector<1x8x256xf32>
    %32 = vector.broadcast %30 : vector<8x1x256xf32> to vector<8x8x256xf32>
    %33 = vector.broadcast %31 : vector<1x8x256xf32> to vector<8x8x256xf32>
    %34 = arith.subf %32, %33 : vector<8x8x256xf32>
    %35 = arith.mulf %34, %34 : vector<8x8x256xf32>
    %36 = arith.addf %29, %35 : vector<8x8x256xf32>
    %37 = vector.shape_cast %2 : vector<1x256xi32> to vector<1x1x256xi32>
    %38 = vector.broadcast %37 : vector<1x1x256xi32> to vector<8x1x256xi32>
    %39 = arith.cmpi slt, %14, %38 : vector<8x1x256xi32>
    %40 = vector.shape_cast %3 : vector<1x256xi32> to vector<1x1x256xi32>
    %41 = vector.broadcast %40 : vector<1x1x256xi32> to vector<1x8x256xi32>
    %42 = arith.cmpi slt, %5, %41 : vector<1x8x256xi32>
    %43 = vector.broadcast %39 : vector<8x1x256xi1> to vector<8x8x256xi1>
    %44 = vector.broadcast %42 : vector<1x8x256xi1> to vector<8x8x256xi1>
    %45 = arith.andi %43, %44 : vector<8x8x256xi1>
    %cst_9 = arith.constant 1.000000e+30 : f32
    %46 = vector.broadcast %cst_9 : f32 to vector<8x8x256xf32>
    %47 = arith.select %45, %36, %46 : vector<8x8x256xi1>, vector<8x8x256xf32>
    %48 = vector.extract_strided_slice %47 {offsets = [0, 0, 0], sizes = [8, 1, 256], strides = [1, 1, 1]} : vector<8x8x256xf32> to vector<8x1x256xf32>
    %49 = vector.extract_strided_slice %47 {offsets = [0, 1, 0], sizes = [8, 1, 256], strides = [1, 1, 1]} : vector<8x8x256xf32> to vector<8x1x256xf32>
    %50 = arith.minimumf %48, %49 : vector<8x1x256xf32>
    %51 = vector.extract_strided_slice %47 {offsets = [0, 2, 0], sizes = [8, 1, 256], strides = [1, 1, 1]} : vector<8x8x256xf32> to vector<8x1x256xf32>
    %52 = arith.minimumf %50, %51 : vector<8x1x256xf32>
    %53 = vector.extract_strided_slice %47 {offsets = [0, 3, 0], sizes = [8, 1, 256], strides = [1, 1, 1]} : vector<8x8x256xf32> to vector<8x1x256xf32>
    %54 = arith.minimumf %52, %53 : vector<8x1x256xf32>
    %55 = vector.extract_strided_slice %47 {offsets = [0, 4, 0], sizes = [8, 1, 256], strides = [1, 1, 1]} : vector<8x8x256xf32> to vector<8x1x256xf32>
    %56 = arith.minimumf %54, %55 : vector<8x1x256xf32>
    %57 = vector.extract_strided_slice %47 {offsets = [0, 5, 0], sizes = [8, 1, 256], strides = [1, 1, 1]} : vector<8x8x256xf32> to vector<8x1x256xf32>
    %58 = arith.minimumf %56, %57 : vector<8x1x256xf32>
    %59 = vector.extract_strided_slice %47 {offsets = [0, 6, 0], sizes = [8, 1, 256], strides = [1, 1, 1]} : vector<8x8x256xf32> to vector<8x1x256xf32>
    %60 = arith.minimumf %58, %59 : vector<8x1x256xf32>
    %61 = vector.extract_strided_slice %47 {offsets = [0, 7, 0], sizes = [8, 1, 256], strides = [1, 1, 1]} : vector<8x8x256xf32> to vector<8x1x256xf32>
    %62 = arith.minimumf %60, %61 : vector<8x1x256xf32>
    %cst_10 = arith.constant dense<0x7F800000> : vector<1x256xf32>
    %63 = vector.multi_reduction <minimumf>, %62, %cst_10 [0] : vector<8x1x256xf32> to vector<1x256xf32>
    %64 = vector.shape_cast %63 : vector<1x256xf32> to vector<1x1x256xf32>
    %65 = vector.broadcast %64 : vector<1x1x256xf32> to vector<8x1x256xf32>
    %66 = arith.cmpf ole, %62, %65 : vector<8x1x256xf32>
    %c8_i32 = arith.constant 8 : i32
    %67 = vector.broadcast %c8_i32 : i32 to vector<8x1x256xi32>
    %68 = arith.select %66, %14, %67 : vector<8x1x256xi1>, vector<8x1x256xi32>
    %cst_11 = arith.constant dense<2147483647> : vector<1x256xi32>
    %69 = vector.multi_reduction <minsi>, %68, %cst_11 [0] : vector<8x1x256xi32> to vector<1x256xi32>
    %70 = vector.shape_cast %69 : vector<1x256xi32> to vector<1x1x256xi32>
    %71 = vector.broadcast %70 : vector<1x1x256xi32> to vector<8x1x256xi32>
    %72 = arith.cmpi eq, %14, %71 : vector<8x1x256xi32>
    %cst_12 = arith.constant 1.000000e+30 : f32
    %73 = vector.shape_cast %72 : vector<8x1x256xi1> to vector<8x1x256xi1>
    %74 = vector.broadcast %73 : vector<8x1x256xi1> to vector<8x8x256xi1>
    %75 = vector.broadcast %cst_12 : f32 to vector<8x8x256xf32>
    %76 = arith.select %74, %47, %75 : vector<8x8x256xi1>, vector<8x8x256xf32>
    %cst_13 = arith.constant dense<0x7F800000> : vector<8x256xf32>
    %77 = vector.multi_reduction <minimumf>, %76, %cst_13 [0] : vector<8x8x256xf32> to vector<8x256xf32>
    %78 = vector.shape_cast %77 : vector<8x256xf32> to vector<1x8x256xf32>
    %79 = vector.broadcast %64 : vector<1x1x256xf32> to vector<1x8x256xf32>
    %80 = arith.cmpf ole, %78, %79 : vector<1x8x256xf32>
    %c8_i32_14 = arith.constant 8 : i32
    %81 = vector.broadcast %c8_i32_14 : i32 to vector<1x8x256xi32>
    %82 = arith.select %80, %5, %81 : vector<1x8x256xi1>, vector<1x8x256xi32>
    %cst_15 = arith.constant dense<2147483647> : vector<1x256xi32>
    %83 = vector.multi_reduction <minsi>, %82, %cst_15 [1] : vector<1x8x256xi32> to vector<1x256xi32>
    %84 = vector.shape_cast %83 : vector<1x256xi32> to vector<1x1x256xi32>
    %85 = vector.broadcast %70 : vector<1x1x256xi32> to vector<8x1x256xi32>
    %86 = arith.cmpi eq, %14, %85 : vector<8x1x256xi32>
    %cst_16 = arith.constant 0.000000e+00 : f32
    %87 = vector.shape_cast %86 : vector<8x1x256xi1> to vector<8x1x256xi1>
    %88 = vector.broadcast %87 : vector<8x1x256xi1> to vector<8x3x256xi1>
    %89 = vector.broadcast %cst_16 : f32 to vector<8x3x256xf32>
    %90 = arith.select %88, %0, %89 : vector<8x3x256xi1>, vector<8x3x256xf32>
    %cst_17 = arith.constant dense<0.000000e+00> : vector<3x256xf32>
    %91 = vector.multi_reduction <add>, %90, %cst_17 [0] : vector<8x3x256xf32> to vector<3x256xf32>
    %92 = vector.shape_cast %84 : vector<1x1x256xi32> to vector<1x256xi32>
    %93 = vector.broadcast %92 : vector<1x256xi32> to vector<8x256xi32>
    %94 = arith.cmpi eq, %4, %93 : vector<8x256xi32>
    %95 = vector.extract_strided_slice %1 {offsets = [0, 0, 0], sizes = [1, 8, 256], strides = [1, 1, 1]} : vector<3x8x256xf32> to vector<1x8x256xf32>
    %96 = vector.shape_cast %95 : vector<1x8x256xf32> to vector<8x256xf32>
    %cst_18 = arith.constant 0.000000e+00 : f32
    %97 = vector.broadcast %cst_18 : f32 to vector<8x256xf32>
    %98 = arith.select %94, %96, %97 : vector<8x256xi1>, vector<8x256xf32>
    %cst_19 = arith.constant dense<0.000000e+00> : vector<256xf32>
    %99 = vector.multi_reduction <add>, %98, %cst_19 [0] : vector<8x256xf32> to vector<256xf32>
    %100 = vector.shape_cast %99 : vector<256xf32> to vector<1x256xf32>
    %101 = vector.extract_strided_slice %1 {offsets = [1, 0, 0], sizes = [1, 8, 256], strides = [1, 1, 1]} : vector<3x8x256xf32> to vector<1x8x256xf32>
    %102 = vector.shape_cast %101 : vector<1x8x256xf32> to vector<8x256xf32>
    %cst_20 = arith.constant 0.000000e+00 : f32
    %103 = vector.broadcast %cst_20 : f32 to vector<8x256xf32>
    %104 = arith.select %94, %102, %103 : vector<8x256xi1>, vector<8x256xf32>
    %cst_21 = arith.constant dense<0.000000e+00> : vector<256xf32>
    %105 = vector.multi_reduction <add>, %104, %cst_21 [0] : vector<8x256xf32> to vector<256xf32>
    %106 = vector.shape_cast %105 : vector<256xf32> to vector<1x256xf32>
    %107 = vector.extract_strided_slice %1 {offsets = [2, 0, 0], sizes = [1, 8, 256], strides = [1, 1, 1]} : vector<3x8x256xf32> to vector<1x8x256xf32>
    %108 = vector.shape_cast %107 : vector<1x8x256xf32> to vector<8x256xf32>
    %cst_22 = arith.constant 0.000000e+00 : f32
    %109 = vector.broadcast %cst_22 : f32 to vector<8x256xf32>
    %110 = arith.select %94, %108, %109 : vector<8x256xi1>, vector<8x256xf32>
    %cst_23 = arith.constant dense<0.000000e+00> : vector<256xf32>
    %111 = vector.multi_reduction <add>, %110, %cst_23 [0] : vector<8x256xf32> to vector<256xf32>
    %112 = vector.shape_cast %111 : vector<256xf32> to vector<1x256xf32>
    %113 = tpu.concatenate %100, %106, %112 in 0 : vector<1x256xf32>, vector<1x256xf32>, vector<1x256xf32> -> vector<3x256xf32>
    %114 = arith.subf %91, %113 : vector<3x256xf32>
    %115 = arith.mulf %114, %114 : vector<3x256xf32>
    %cst_24 = arith.constant dense<0.000000e+00> : vector<256xf32>
    %116 = vector.multi_reduction <add>, %115, %cst_24 [0] : vector<3x256xf32> to vector<256xf32>
    %117 = vector.shape_cast %116 : vector<256xf32> to vector<1x256xf32>
    %118 = math.sqrt %117 : vector<1x256xf32>
    %cst_25 = arith.constant 0.000000e+00 : f32
    %119 = vector.broadcast %cst_25 : f32 to vector<1x256xf32>
    %120 = arith.cmpf ogt, %118, %119 : vector<1x256xf32>
    %cst_26 = arith.constant 1.000000e+00 : f32
    %121 = vector.broadcast %cst_26 : f32 to vector<1x256xf32>
    %122 = arith.select %120, %118, %121 : vector<1x256xi1>, vector<1x256xf32>
    %123 = tpu.reciprocal %122 : vector<1x256xf32> -> vector<1x256xf32>
    %124 = vector.broadcast %123 : vector<1x256xf32> to vector<3x256xf32>
    %125 = arith.mulf %114, %124 : vector<3x256xf32>
    %126 = vector.extract_strided_slice %125 {offsets = [0, 0], sizes = [1, 256], strides = [1, 1]} : vector<3x256xf32> to vector<1x256xf32>
    %127 = vector.broadcast %126 : vector<1x256xf32> to vector<3x256xf32>
    %128 = arith.mulf %127, %125 : vector<3x256xf32>
    %129 = vector.extract_strided_slice %125 {offsets = [1, 0], sizes = [1, 256], strides = [1, 1]} : vector<3x256xf32> to vector<1x256xf32>
    %130 = vector.broadcast %129 : vector<1x256xf32> to vector<3x256xf32>
    %131 = arith.mulf %130, %125 : vector<3x256xf32>
    %132 = vector.extract_strided_slice %125 {offsets = [2, 0], sizes = [1, 256], strides = [1, 1]} : vector<3x256xf32> to vector<1x256xf32>
    %133 = vector.broadcast %132 : vector<1x256xf32> to vector<3x256xf32>
    %134 = arith.mulf %133, %125 : vector<3x256xf32>
    %135 = tpu.concatenate %91, %113, %125, %118, %128, %131, %134 in 0 : vector<3x256xf32>, vector<3x256xf32>, vector<3x256xf32>, vector<1x256xf32>, vector<3x256xf32>, vector<3x256xf32>, vector<3x256xf32> -> vector<19x256xf32>
    %c0_27 = arith.constant 0 : index
    %c0_28 = arith.constant 0 : index
    %136 = vector.load %arg5[%c0_27, %c0_28] : memref<19x256xf32, #tpu.memory_space<vmem>>, vector<19x256xf32>
    tpu.vector_store %arg5[%c0_27, %c0_28], %135 {strides = array<i32>} : memref<19x256xf32, #tpu.memory_space<vmem>>, vector<19x256xf32>,
    return
  }
  func.func @transform_0(%arg0: i32) -> (i32, i32) {
    %c0_i32 = arith.constant 0 : i32
    %c0_i32_0 = arith.constant 0 : i32
    return %c0_i32, %arg0 : i32, i32
  }
  func.func @transform_1(%arg0: i32) -> (i32, i32) {
    %c0_i32 = arith.constant 0 : i32
    %c0_i32_0 = arith.constant 0 : i32
    return %c0_i32, %arg0 : i32, i32
  }
  func.func @transform_2(%arg0: i32) -> (i32, i32, i32) {
    %c0_i32 = arith.constant 0 : i32
    %c0_i32_0 = arith.constant 0 : i32
    %c0_i32_1 = arith.constant 0 : i32
    return %c0_i32, %c0_i32_0, %arg0 : i32, i32, i32
  }
  func.func @transform_3(%arg0: i32) -> (i32, i32, i32) {
    %c0_i32 = arith.constant 0 : i32
    %c0_i32_0 = arith.constant 0 : i32
    %c0_i32_1 = arith.constant 0 : i32
    return %c0_i32, %c0_i32_0, %arg0 : i32, i32, i32
  }
  func.func @transform_4(%arg0: i32) -> (i32, i32) {
    %c0_i32 = arith.constant 0 : i32
    %c0_i32_0 = arith.constant 0 : i32
    return %c0_i32, %arg0 : i32, i32
  }
}

</mosaic_0001>

<bundles_post_ra>
// kernel: tpu_custom_call.1
= control target key start
LH: loop header
LB: loop body
LE: loop exit
PB: predicated region body
PF: predicated region fallthrough
CT: control target
= control target key end

     0   :  { %9 = vsyncpa [#allocation3], 0  ;;  %v34_v0 = vlaneseq  ;;  %s1351_s7 = smov 16   ;;  %s2359_s0 = inlined_call_operand.vmem [shape: s32[1,256], index: 0, kind: input, shape index: {}]   ;;  %s2360_s1 = inlined_call_operand.vmem [shape: s32[1,256], index: 1, kind: input, shape index: {}]   ;;  %s2361_s2 = inlined_call_operand.vmem [shape: f32[8,3,256], index: 2, kind: input, shape index: {}]   ;;  %s2362_s3 = inlined_call_operand.vmem [shape: f32[3,8,256], index: 3, kind: input, shape index: {}]   ;;  %s2363_s4 = inlined_call_operand.hbm [shape: f32[19,256], index: 4, kind: output, shape index: {}]  }
   0x1   :  { %v1380_v1 = vld [vmem:[%s2361_s2] sm:$0x77]  ;;  %v1385_v2 = vld [vmem:[%s2361_s2 + $0x8] sm:$0x77]  ;;  %v1390_v3 = vld [vmem:[%s2361_s2 + $0x10] sm:$0x77] }
   0x2   :  { %v1395_v4 = vld [vmem:[%s2361_s2 + $0x18] sm:$0x77]  ;;  %v1400_v5 = vld [vmem:[%s2361_s2 + $0x20] sm:$0x77]  ;;  %v1405_v6 = vld [vmem:[%s2361_s2 + $0x28] sm:$0x77] }
   0x3   :  { %2379 = vst [vmem:[#allocation5_spill] sm:$0xff] %v1400_v5  ;;  %v1410_v7 = vld [vmem:[%s2361_s2 + $0x30] sm:$0x77]  ;;  %v1412_v8 = vshrl.u32 %v34_v0, 7  ;;  %v1417_v9 = vld [vmem:[%s2361_s2 + $0x38] sm:$0x77] }
   0x4   :  { %2380 = vst [vmem:[#allocation6_spill] sm:$0xff] %v1405_v6  ;;  %v44_v10 = vperm.slane %v1380_v1, 0  ;;  %v45_v11 = vperm.slane %v1380_v1, 4  ;;  %v46_v12 = vperm.slane %v1385_v2, 0  ;;  %v47_v13 = vperm.slane %v1385_v2, 4  ;;  %v26_v30 = vld [vmem:[%s2362_s3] sm:$0xff] }
   0x5   :  { %2381 = vst [vmem:[#allocation7_spill] sm:$0xff] %v1410_v7  ;;  %v48_v14 = vperm.slane %v1390_v3, 0  ;;  %v49_v15 = vperm.slane %v1390_v3, 4  ;;  %v50_v16 = vperm.slane %v1395_v4, 0  ;;  %v51_v17 = vperm.slane %v1395_v4, 4  ;;  %v27_v31 = vld [vmem:[%s2362_s3 + $0x8] sm:$0xff] }
   0x6   :  { %2382 = vst [vmem:[#allocation8_spill] sm:$0xff] %v1412_v8  ;;  %v52_v18 = vperm.slane %v1400_v5, 0  ;;  %v53_v19 = vperm.slane %v1400_v5, 4  ;;  %v54_v20 = vperm.slane %v1405_v6, 0  ;;  %v55_v21 = vperm.slane %v1405_v6, 4  ;;  %s1290_s6 = sshll.u32 %s2363_s4, 4  ;;  %s1291_s6 = int_to_ptr.hbm [resolvable:$true] %s1290_s6 }
   0x7   :  { %2383 = vst [vmem:[#allocation9_spill] sm:$0xff] %v1417_v9  ;;  %v56_v22 = vperm.slane %v1410_v7, 0  ;;  %v57_v23 = vperm.slane %v1410_v7, 4  ;;  %v58_v24 = vperm.slane %v1417_v9, 0  ;;  %v59_v25 = vperm.slane %v1417_v9, 4  ;;  %s1350_s4 = smov 256  }
   0x8   :  { %1015 = vst [vmem:[#allocation1] ss:$2 sm:$0xff] %v1380_v1  ;;  %v76_v26 = vperm.slane %v44_v10, 0  ;;  %v77_v27 = vperm.slane %v45_v11, 0  ;;  %v78_v28 = vperm.slane %v46_v12, 0  ;;  %v79_v29 = vperm.slane %v47_v13, 0 }
   0x9   :  { %1019 = vst [vmem:[#allocation1 + $0x10] ss:$2 sm:$0xff] %v1385_v2  ;;  %v80_v32 = vperm.slane %v48_v14, 0  ;;  %v81_v33 = vperm.slane %v49_v15, 0  ;;  %v82_v34 = vperm.slane %v50_v16, 0  ;;  %v83_v35 = vperm.slane %v51_v17, 0 }
   0xa   :  { %1023 = vst [vmem:[#allocation1 + $0x20] ss:$2 sm:$0xff] %v1390_v3  ;;  %v84_v36 = vperm.slane %v52_v18, 0  ;;  %v85_v37 = vperm.slane %v53_v19, 0  ;;  %v86_v38 = vperm.slane %v54_v20, 0  ;;  %v87_v39 = vperm.slane %v55_v21, 0 }
   0xb   :  { %1027 = vst [vmem:[#allocation1 + $0x30] ss:$2 sm:$0xff] %v1395_v4  ;;  %v88_v40 = vperm.slane %v56_v22, 0  ;;  %v89_v41 = vperm.slane %v57_v23, 0  ;;  %v90_v42 = vperm.slane %v58_v24, 0  ;;  %v91_v43 = vperm.slane %v59_v25, 0 }
   0xc   :  { %v92_v44 = vsub.f32 %v76_v26, %v26_v30  ;;  %v93_v45 = vsub.f32 %v77_v27, %v27_v31  ;;  %v94_v46 = vsub.f32 %v78_v28, %v26_v30  ;;  %v95_v47 = vsub.f32 %v79_v29, %v27_v31 }
   0xd   :  { %v96_v48 = vsub.f32 %v80_v32, %v26_v30  ;;  %v97_v49 = vsub.f32 %v81_v33, %v27_v31  ;;  %v98_v50 = vsub.f32 %v82_v34, %v26_v30  ;;  %v99_v51 = vsub.f32 %v83_v35, %v27_v31 }
   0xe   :  { %v100_v52 = vsub.f32 %v84_v36, %v26_v30  ;;  %v101_v53 = vsub.f32 %v85_v37, %v27_v31  ;;  %v102_v54 = vsub.f32 %v86_v38, %v26_v30  ;;  %v103_v55 = vsub.f32 %v87_v39, %v27_v31 }
   0xf   :  { %v104_v56 = vsub.f32 %v88_v40, %v26_v30  ;;  %v105_v57 = vsub.f32 %v89_v41, %v27_v31  ;;  %v106_v58 = vsub.f32 %v90_v42, %v26_v30  ;;  %v107_v59 = vsub.f32 %v91_v43, %v27_v31  ;;  %v28_v41 = vld [vmem:[%s2362_s3 + $0x10] sm:$0xff]  ;;  %v29_v42 = vld [vmem:[%s2362_s3 + $0x18] sm:$0xff] }
  0x10   :  { %v1445_v60 = vmul.f32 %v92_v44, %v92_v44  ;;  %v1447_v61 = vmul.f32 %v93_v45, %v93_v45  ;;  %v1449_v62 = vmul.f32 %v94_v46, %v94_v46  ;;  %v1451_v63 = vmul.f32 %v95_v47, %v95_v47 }
  0x11   :  { %v1453_v0 = vmul.f32 %v96_v48, %v96_v48  ;;  %v1455_v10 = vmul.f32 %v97_v49, %v97_v49  ;;  %v1457_v11 = vmul.f32 %v98_v50, %v98_v50  ;;  %v1459_v12 = vmul.f32 %v99_v51, %v99_v51 }
  0x12   :  { %v1461_v13 = vmul.f32 %v100_v52, %v100_v52  ;;  %v1463_v14 = vmul.f32 %v101_v53, %v101_v53  ;;  %v1465_v15 = vmul.f32 %v102_v54, %v102_v54  ;;  %v1467_v16 = vmul.f32 %v103_v55, %v103_v55 }
  0x13   :  { %v1469_v17 = vmul.f32 %v104_v56, %v104_v56  ;;  %v1471_v18 = vmul.f32 %v105_v57, %v105_v57  ;;  %v1473_v19 = vmul.f32 %v106_v58, %v106_v58  ;;  %v1475_v20 = vmul.f32 %v107_v59, %v107_v59 }
  0x14   :  { %v140_v21 = vperm.slane %v1380_v1, 1  ;;  %v141_v22 = vperm.slane %v1380_v1, 5  ;;  %v142_v23 = vperm.slane %v1385_v2, 1  ;;  %v143_v24 = vperm.slane %v1385_v2, 5 }
  0x15   :  { %v144_v25 = vperm.slane %v1390_v3, 1  ;;  %v145_v26 = vperm.slane %v1390_v3, 5  ;;  %v146_v27 = vperm.slane %v1395_v4, 1  ;;  %v147_v28 = vperm.slane %v1395_v4, 5 }
  0x16   :  { %v148_v29 = vperm.slane %v1400_v5, 1  ;;  %v149_v30 = vperm.slane %v1400_v5, 5  ;;  %v150_v31 = vperm.slane %v1405_v6, 1  ;;  %v151_v32 = vperm.slane %v1405_v6, 5 }
  0x17   :  { %v152_v33 = vperm.slane %v1410_v7, 1  ;;  %v153_v34 = vperm.slane %v1410_v7, 5  ;;  %v154_v35 = vperm.slane %v1417_v9, 1  ;;  %v155_v36 = vperm.slane %v1417_v9, 5 }
  0x18   :  { %v172_v37 = vperm.slane %v140_v21, 1  ;;  %v173_v38 = vperm.slane %v141_v22, 1  ;;  %v174_v39 = vperm.slane %v142_v23, 1  ;;  %v175_v40 = vperm.slane %v143_v24, 1 }
  0x19   :  { %v176_v43 = vperm.slane %v144_v25, 1  ;;  %v177_v44 = vperm.slane %v145_v26, 1  ;;  %v178_v45 = vperm.slane %v146_v27, 1  ;;  %v179_v46 = vperm.slane %v147_v28, 1 }
  0x1a   :  { %v180_v47 = vperm.slane %v148_v29, 1  ;;  %v181_v48 = vperm.slane %v149_v30, 1  ;;  %v182_v49 = vperm.slane %v150_v31, 1  ;;  %v183_v50 = vperm.slane %v151_v32, 1 }
  0x1b   :  { %v184_v51 = vperm.slane %v152_v33, 1  ;;  %v185_v52 = vperm.slane %v153_v34, 1  ;;  %v186_v53 = vperm.slane %v154_v35, 1  ;;  %v187_v54 = vperm.slane %v155_v36, 1 }
  0x1c   :  { %v188_v55 = vsub.f32 %v172_v37, %v28_v41  ;;  %v189_v56 = vsub.f32 %v173_v38, %v29_v42  ;;  %v190_v57 = vsub.f32 %v174_v39, %v28_v41  ;;  %v191_v58 = vsub.f32 %v175_v40, %v29_v42 }
  0x1d   :  { %v192_v59 = vsub.f32 %v176_v43, %v28_v41  ;;  %v193_v21 = vsub.f32 %v177_v44, %v29_v42  ;;  %v194_v22 = vsub.f32 %v178_v45, %v28_v41  ;;  %v195_v23 = vsub.f32 %v179_v46, %v29_v42 }
  0x1e   :  { %v196_v24 = vsub.f32 %v180_v47, %v28_v41  ;;  %v197_v25 = vsub.f32 %v181_v48, %v29_v42  ;;  %v198_v26 = vsub.f32 %v182_v49, %v28_v41  ;;  %v199_v27 = vsub.f32 %v183_v50, %v29_v42 }
  0x1f   :  { %v200_v28 = vsub.f32 %v184_v51, %v28_v41  ;;  %v201_v29 = vsub.f32 %v185_v52, %v29_v42  ;;  %v202_v30 = vsub.f32 %v186_v53, %v28_v41  ;;  %v203_v31 = vsub.f32 %v187_v54, %v29_v42 }
  0x20   :  { %v204_v32 = vmul.f32 %v188_v55, %v188_v55  ;;  %v205_v33 = vmul.f32 %v189_v56, %v189_v56  ;;  %v206_v34 = vmul.f32 %v190_v57, %v190_v57  ;;  %v207_v35 = vmul.f32 %v191_v58, %v191_v58 }
  0x21   :  { %v208_v36 = vmul.f32 %v192_v59, %v192_v59  ;;  %v209_v37 = vmul.f32 %v193_v21, %v193_v21  ;;  %v210_v38 = vmul.f32 %v194_v22, %v194_v22  ;;  %v211_v39 = vmul.f32 %v195_v23, %v195_v23 }
  0x22   :  { %v212_v40 = vmul.f32 %v196_v24, %v196_v24  ;;  %v213_v43 = vmul.f32 %v197_v25, %v197_v25  ;;  %v214_v44 = vmul.f32 %v198_v26, %v198_v26  ;;  %v215_v45 = vmul.f32 %v199_v27, %v199_v27  ;;  %v30_v25 = vld [vmem:[%s2362_s3 + $0x20] sm:$0xff]  ;;  %v31_v26 = vld [vmem:[%s2362_s3 + $0x28] sm:$0xff] }
  0x23   :  { %v216_v46 = vmul.f32 %v200_v28, %v200_v28  ;;  %v217_v47 = vmul.f32 %v201_v29, %v201_v29  ;;  %v218_v48 = vmul.f32 %v202_v30, %v202_v30  ;;  %v219_v49 = vmul.f32 %v203_v31, %v203_v31 }
  0x24   :  { %v1500_v50 = vadd.f32 %v204_v32, %v1445_v60  ;;  %v1503_v41 = vadd.f32 %v205_v33, %v1447_v61  ;;  %v1506_v42 = vadd.f32 %v206_v34, %v1449_v62  ;;  %v1509_v51 = vadd.f32 %v207_v35, %v1451_v63 }
  0x25   :  { %v1512_v52 = vadd.f32 %v208_v36, %v1453_v0  ;;  %v1515_v53 = vadd.f32 %v209_v37, %v1455_v10  ;;  %v1518_v54 = vadd.f32 %v210_v38, %v1457_v11  ;;  %v1521_v60 = vadd.f32 %v211_v39, %v1459_v12 }
  0x26   :  { %v1524_v61 = vadd.f32 %v212_v40, %v1461_v13  ;;  %v1527_v62 = vadd.f32 %v213_v43, %v1463_v14  ;;  %v1530_v63 = vadd.f32 %v214_v44, %v1465_v15  ;;  %v1533_v0 = vadd.f32 %v215_v45, %v1467_v16 }
  0x27   :  { %v1536_v10 = vadd.f32 %v216_v46, %v1469_v17  ;;  %v1539_v11 = vadd.f32 %v217_v47, %v1471_v18  ;;  %v1542_v12 = vadd.f32 %v218_v48, %v1473_v19  ;;  %v1545_v13 = vadd.f32 %v219_v49, %v1475_v20 }
  0x28   :  { %v236_v14 = vperm.slane %v1380_v1, 2  ;;  %v237_v15 = vperm.slane %v1380_v1, 6  ;;  %v238_v55 = vperm.slane %v1385_v2, 2  ;;  %v239_v16 = vperm.slane %v1385_v2, 6 }
  0x29   :  { %v240_v17 = vperm.slane %v1390_v3, 2  ;;  %v241_v56 = vperm.slane %v1390_v3, 6  ;;  %v242_v18 = vperm.slane %v1395_v4, 2  ;;  %v243_v19 = vperm.slane %v1395_v4, 6 }
  0x2a   :  { %v244_v57 = vperm.slane %v1400_v5, 2  ;;  %v245_v20 = vperm.slane %v1400_v5, 6  ;;  %v246_v58 = vperm.slane %v1405_v6, 2  ;;  %v247_v1 = vperm.slane %v1405_v6, 6 }
  0x2b   :  { %v248_v59 = vperm.slane %v1410_v7, 2  ;;  %v249_v2 = vperm.slane %v1410_v7, 6  ;;  %v250_v21 = vperm.slane %v1417_v9, 2  ;;  %v251_v3 = vperm.slane %v1417_v9, 6 }
  0x2c   :  { %v268_v22 = vperm.slane %v236_v14, 2  ;;  %v269_v23 = vperm.slane %v237_v15, 2  ;;  %v270_v24 = vperm.slane %v238_v55, 2  ;;  %v271_v4 = vperm.slane %v239_v16, 2 }
  0x2d   :  { %v272_v27 = vperm.slane %v240_v17, 2  ;;  %v273_v28 = vperm.slane %v241_v56, 2  ;;  %v274_v29 = vperm.slane %v242_v18, 2  ;;  %v275_v30 = vperm.slane %v243_v19, 2 }
  0x2e   :  { %v276_v31 = vperm.slane %v244_v57, 2  ;;  %v277_v32 = vperm.slane %v245_v20, 2  ;;  %v278_v33 = vperm.slane %v246_v58, 2  ;;  %v279_v34 = vperm.slane %v247_v1, 2 }
  0x2f   :  { %v280_v35 = vperm.slane %v248_v59, 2  ;;  %v281_v36 = vperm.slane %v249_v2, 2  ;;  %v282_v37 = vperm.slane %v250_v21, 2  ;;  %v283_v38 = vperm.slane %v251_v3, 2 }
  0x30   :  { %v284_v39 = vsub.f32 %v268_v22, %v30_v25  ;;  %v285_v40 = vsub.f32 %v269_v23, %v31_v26  ;;  %v286_v43 = vsub.f32 %v270_v24, %v30_v25  ;;  %v287_v44 = vsub.f32 %v271_v4, %v31_v26 }
  0x31   :  { %v288_v45 = vsub.f32 %v272_v27, %v30_v25  ;;  %v289_v46 = vsub.f32 %v273_v28, %v31_v26  ;;  %v290_v47 = vsub.f32 %v274_v29, %v30_v25  ;;  %v291_v48 = vsub.f32 %v275_v30, %v31_v26 }
  0x32   :  { %v292_v49 = vsub.f32 %v276_v31, %v30_v25  ;;  %v293_v14 = vsub.f32 %v277_v32, %v31_v26  ;;  %v294_v15 = vsub.f32 %v278_v33, %v30_v25  ;;  %v295_v55 = vsub.f32 %v279_v34, %v31_v26  ;;  %v33_v33 = vld [vmem:[%s2360_s1] sm:$0x3] }
  0x33   :  { %v296_v16 = vsub.f32 %v280_v35, %v30_v25  ;;  %v297_v17 = vsub.f32 %v281_v36, %v31_v26  ;;  %v298_v56 = vsub.f32 %v282_v37, %v30_v25  ;;  %v299_v18 = vsub.f32 %v283_v38, %v31_v26  ;;  %v32_v25 = vld [vmem:[%s2359_s0] sm:$0x3] }
  0x34   :  { %v300_v19 = vmul.f32 %v284_v39, %v284_v39  ;;  %v301_v57 = vmul.f32 %v285_v40, %v285_v40  ;;  %v302_v20 = vmul.f32 %v286_v43, %v286_v43  ;;  %v303_v58 = vmul.f32 %v287_v44, %v287_v44 }
  0x35   :  { %v304_v1 = vmul.f32 %v288_v45, %v288_v45  ;;  %v305_v59 = vmul.f32 %v289_v46, %v289_v46  ;;  %v306_v2 = vmul.f32 %v290_v47, %v290_v47  ;;  %v307_v21 = vmul.f32 %v291_v48, %v291_v48 }
  0x36   :  { %v308_v3 = vmul.f32 %v292_v49, %v292_v49  ;;  %v309_v22 = vmul.f32 %v293_v14, %v293_v14  ;;  %v310_v23 = vmul.f32 %v294_v15, %v294_v15  ;;  %v311_v24 = vmul.f32 %v295_v55, %v295_v55 }
  0x37   :  { %v312_v4 = vmul.f32 %v296_v16, %v296_v16  ;;  %v313_v27 = vmul.f32 %v297_v17, %v297_v17  ;;  %v314_v28 = vmul.f32 %v298_v56, %v298_v56  ;;  %v315_v29 = vmul.f32 %v299_v18, %v299_v18 }
  0x38   :  { %v1573_v26 = vadd.f32 %v300_v19, %v1500_v50  ;;  %v1576_v30 = vadd.f32 %v301_v57, %v1503_v41  ;;  %v1579_v31 = vadd.f32 %v302_v20, %v1506_v42  ;;  %v1582_v32 = vadd.f32 %v303_v58, %v1509_v51 }
  0x39   :  { %v1588_v34 = vadd.f32 %v304_v1, %v1512_v52  ;;  %v1591_v35 = vadd.f32 %v305_v59, %v1515_v53  ;;  %v1594_v50 = vadd.f32 %v306_v2, %v1518_v54  ;;  %v1597_v41 = vadd.f32 %v307_v21, %v1521_v60 }
  0x3a   :  { %v1600_v42 = vadd.f32 %v308_v3, %v1524_v61  ;;  %v1603_v51 = vadd.f32 %v309_v22, %v1527_v62  ;;  %v1606_v36 = vadd.f32 %v310_v23, %v1530_v63  ;;  %v1609_v52 = vadd.f32 %v311_v24, %v1533_v0 }
  0x3b   :  { %v1612_v53 = vadd.f32 %v312_v4, %v1536_v10  ;;  %v1615_v54 = vadd.f32 %v313_v27, %v1539_v11  ;;  %v332_v60 = vperm.slane %v32_v25, 0  ;;  %v333_v37 = vperm.slane %v32_v25, 1 }
  0x3c   :  { %v1618_v61 = vadd.f32 %v314_v28, %v1542_v12  ;;  %v1621_v62 = vadd.f32 %v315_v29, %v1545_v13  ;;  %v350_v38 = vperm.slane %v33_v33, 0  ;;  %v351_v63 = vperm.slane %v33_v33, 1 }
  0x3d   :  { %vm335_vm1 = vcmp.gt.s32.totalorder %v333_v37, 0  ;;  %vm337_vm3 = vcmp.gt.s32.totalorder %v333_v37, 1  ;;  %vm338_vm4 = vcmp.gt.s32.totalorder %v332_v60, 2  ;;  %vm339_vm5 = vcmp.gt.s32.totalorder %v333_v37, 2 }
  0x3e   :  { %vm340_vm6 = vcmp.gt.s32.totalorder %v332_v60, 3  ;;  %vm341_vm7 = vcmp.gt.s32.totalorder %v333_v37, 3  ;;  %vm343_vm9 = vcmp.gt.s32.totalorder %v333_v37, 4  ;;  %vm344_vm10 = vcmp.gt.s32.totalorder %v332_v60, 5 }
  0x3f   :  { %vm345_vm11 = vcmp.gt.s32.totalorder %v333_v37, 5  ;;  %vm346_vm12 = vcmp.gt.s32.totalorder %v332_v60, 6  ;;  %vm347_vm13 = vcmp.gt.s32.totalorder %v333_v37, 6  ;;  %vm349_vm15 = vcmp.gt.s32.totalorder %v333_v37, 7 }
  0x40   :  { %vm1624_vm0 = vcmp.lt.s32.totalorder %v1412_v8, %v350_v38  ;;  %vm1629_vm2 = vcmp.lt.s32.totalorder %v1412_v8, %v351_v63  ;;  %v2364_v11 = vmov 0   ;;  %vm2388_vm8 = vcmp.gt.s32.totalorder %v332_v60, 0 }
  0x41   :  { %v354_v12 = vsel %vm2388_vm8, 1, %v2364_v11  ;;  %v355_v13 = vsel %vm335_vm1, 1, %v2364_v11  ;;  %vm2389_vm14 = vcmp.gt.s32.totalorder %v332_v60, 1  ;;  %v357_v40 = vsel %vm337_vm3, 1, %v2364_v11 }
  0x42   :  { %v356_v39 = vsel %vm2389_vm14, 1, %v2364_v11  ;;  %v358_v43 = vsel %vm338_vm4, 1, %v2364_v11  ;;  %v359_v44 = vsel %vm339_vm5, 1, %v2364_v11  ;;  %v360_v45 = vsel %vm340_vm6, 1, %v2364_v11 }
  0x43   :  { %v361_v46 = vsel %vm341_vm7, 1, %v2364_v11  ;;  %vm2390_vm1 = vcmp.gt.s32.totalorder %v332_v60, 4  ;;  %v363_v48 = vsel %vm343_vm9, 1, %v2364_v11  ;;  %v364_v49 = vsel %vm344_vm10, 1, %v2364_v11 }
  0x44   :  { %v362_v47 = vsel %vm2390_vm1, 1, %v2364_v11  ;;  %v365_v14 = vsel %vm345_vm11, 1, %v2364_v11  ;;  %v366_v15 = vsel %vm346_vm12, 1, %v2364_v11  ;;  %v367_v55 = vsel %vm347_vm13, 1, %v2364_v11 }
  0x45   :  { %vm2391_vm3 = vcmp.gt.s32.totalorder %v332_v60, 7  ;;  %v370_v17 = vperm.slane %v354_v12, 0  ;;  %v371_v56 = vperm.slane %v355_v13, 0  ;;  %v369_v18 = vsel %vm349_vm15, 1, %v2364_v11 }
  0x46   :  { %v368_v16 = vsel %vm2391_vm3, 1, %v2364_v11  ;;  %v372_v19 = vperm.slane %v356_v39, 0  ;;  %v373_v57 = vperm.slane %v357_v40, 0  ;;  %v374_v20 = vperm.slane %v358_v43, 0 }
  0x47   :  { %v375_v58 = vperm.slane %v359_v44, 0  ;;  %v376_v1 = vperm.slane %v360_v45, 0  ;;  %v377_v59 = vperm.slane %v361_v46, 0  ;;  %v378_v2 = vperm.slane %v362_v47, 0 }
  0x48   :  { %v379_v21 = vperm.slane %v363_v48, 0  ;;  %v380_v3 = vperm.slane %v364_v49, 0  ;;  %v381_v22 = vperm.slane %v365_v14, 0  ;;  %v382_v23 = vperm.slane %v366_v15, 0 }
  0x49   :  { %v383_v24 = vperm.slane %v367_v55, 0  ;;  %v384_v4 = vperm.slane %v368_v16, 0  ;;  %vm1665_vm4 = vcmp.eq.s32.totalorder %v370_v17, 1  ;;  %vm1669_vm5 = vcmp.eq.s32.totalorder %v371_v56, 1 }
  0x4a   :  { %v385_v29 = vperm.slane %v369_v18, 0  ;;  %vm1673_vm6 = vcmp.eq.s32.totalorder %v372_v19, 1  ;;  %vm1677_vm7 = vcmp.eq.s32.totalorder %v373_v57, 1  ;;  %vm1681_vm8 = vcmp.eq.s32.totalorder %v374_v20, 1  ;;  %vm406_vm9 = vmand %vm1665_vm4, %vm1624_vm0 }
  0x4b   :  { %vm1689_vm10 = vcmp.eq.s32.totalorder %v375_v58, 1  ;;  %vm1693_vm11 = vcmp.eq.s32.totalorder %v376_v1, 1  ;;  %vm1697_vm12 = vcmp.eq.s32.totalorder %v377_v59, 1  ;;  %vm1701_vm13 = vcmp.eq.s32.totalorder %v378_v2, 1  ;;  %vm407_vm14 = vmand %vm1669_vm5, %vm1629_vm2 }
  0x4c   :  { %v2408_v12 = vmov 0  ;;  %vm1709_vm15 = vcmp.eq.s32.totalorder %v379_v21, 1  ;;  %v2410_v13 = vmov 0  ;;  %vm1713_vm1 = vcmp.eq.s32.totalorder %v380_v3, 1  ;;  %vm408_vm5 = vmand %vm1673_vm6, %vm1624_vm0 }
  0x4d   :  { %v2409_v12 = vsel %vm1701_vm13, 4294967295, %v2408_v12  ;;  %v2411_v13 = vsel %vm1709_vm15, 4294967295, %v2410_v13  ;;  %vm1717_vm3 = vcmp.eq.s32.totalorder %v381_v22, 1  ;;  %v2414_v40 = vmov 0  ;;  %vm410_vm6 = vmand %vm1681_vm8, %vm1624_vm0 }
  0x4e   :  { %v2415_v40 = vsel %vm1717_vm3, 4294967295, %v2414_v40  ;;  %vm1721_vm4 = vcmp.eq.s32.totalorder %v382_v23, 1  ;;  %vm1729_vm13 = vcmp.eq.s32.totalorder %v383_v24, 1  ;;  %vm1733_vm15 = vcmp.eq.s32.totalorder %v384_v4, 1  ;;  %vm409_vm3 = vmand %vm1677_vm7, %vm1629_vm2 }
  0x4f   :  { %v1742_v46 = vsel %vm406_vm9, %v1573_v26, 1e+30  ;;  %v1745_v47 = vsel %vm407_vm14, %v1576_v30, 1e+30  ;;  %v1752_v48 = vsel %vm408_vm5, %v1579_v31, 1e+30  ;;  %vm411_vm9 = vmand %vm1689_vm10, %vm1629_vm2 }
  0x50   :  { %v1755_v49 = vsel %vm409_vm3, %v1582_v32, 1e+30  ;;  %v454_v14 = vrot.slane %v1742_v46, 1  ;;  %v455_v15 = vrot.slane %v1745_v47, 1  ;;  %vm1759_vm7 = vcmp.eq.s32.totalorder %v385_v29, 1  ;;  %vm412_vm8 = vmand %vm1693_vm11, %vm1624_vm0 }
  0x51   :  { %v1768_v30 = vsel %vm410_vm6, %v1588_v34, 1e+30  ;;  %v456_v31 = vrot.slane %v1752_v48, 1  ;;  %v457_v32 = vrot.slane %v1755_v49, 1  ;;  %v1777_v55 = vsel %vm411_vm9, %v1591_v35, 1e+30  ;;  %vm413_vm10 = vmand %vm1697_vm12, %vm1629_vm2 }
  0x52   :  { %v458_v16 = vrot.slane %v1768_v30, 1  ;;  %v486_v17 = vmin.f32 %v1742_v46, %v454_v14  ;;  %v502_v56 = vrot.slane %v1742_v46, 2  ;;  %v1787_v34 = vsel %vm412_vm8, %v1594_v50, 1e+30  ;;  %vm416_vm5 = vmand %vm1713_vm1, %vm1624_vm0 }
  0x53   :  { %v459_v18 = vrot.slane %v1777_v55, 1  ;;  %v487_v19 = vmin.f32 %v1745_v47, %v455_v15  ;;  %v488_v35 = vmin.f32 %v1752_v48, %v456_v31  ;;  %vm2424_vm11 = vnez %v2409_v12  ;;  %vm418_vm1 = vmand %vm1721_vm4, %vm1624_vm0 }
  0x54   :  { %vm414_vm14 = vmand %vm2424_vm11, %vm1624_vm0  ;;  %v1797_v57 = vsel %vm413_vm10, %v1597_v41, 1e+30  ;;  %v460_v20 = vrot.slane %v1787_v34, 1  ;;  %v489_v58 = vmin.f32 %v1755_v49, %v457_v32  ;;  %v490_v50 = vmin.f32 %v1768_v30, %v458_v16 }
  0x55   :  { %vm2425_vm12 = vnez %v2411_v13  ;;  %v1807_v1 = vsel %vm414_vm14, %v1600_v42, 1e+30  ;;  %v461_v59 = vrot.slane %v1797_v57, 1  ;;  %v491_v2 = vmin.f32 %v1777_v55, %v459_v18  ;;  %vm419_vm8 = vmand %vm1729_vm13, %vm1629_vm2 }
  0x56   :  { %vm415_vm3 = vmand %vm2425_vm12, %vm1629_vm2  ;;  %v503_v41 = vrot.slane %v1745_v47, 2  ;;  %v462_v3 = vrot.slane %v1807_v1, 1  ;;  %v492_v22 = vmin.f32 %v1787_v34, %v460_v20  ;;  %v504_v42 = vrot.slane %v1752_v48, 2 }
  0x57   :  { %v1817_v21 = vsel %vm415_vm3, %v1603_v51, 1e+30  ;;  %vm2426_vm6 = vnez %v2415_v40  ;;  %v1827_v23 = vsel %vm416_vm5, %v1606_v36, 1e+30  ;;  %v493_v4 = vmin.f32 %v1797_v57, %v461_v59  ;;  %vm420_vm4 = vmand %vm1733_vm15, %vm1624_vm0 }
  0x58   :  { %vm417_vm9 = vmand %vm2426_vm6, %vm1629_vm2  ;;  %v463_v24 = vrot.slane %v1817_v21, 1  ;;  %v505_v51 = vrot.slane %v1755_v49, 2  ;;  %v464_v28 = vrot.slane %v1827_v23, 1  ;;  %v494_v29 = vmin.f32 %v1807_v1, %v462_v3 }
  0x59   :  { %v1837_v27 = vsel %vm417_vm9, %v1609_v52, 1e+30  ;;  %v506_v36 = vrot.slane %v1768_v30, 2  ;;  %v1847_v25 = vsel %vm418_vm1, %v1612_v53, 1e+30  ;;  %v507_v52 = vrot.slane %v1777_v55, 2  ;;  %vm421_vm13 = vmand %vm1759_vm7, %vm1629_vm2 }
  0x5a   :  { %v465_v33 = vrot.slane %v1837_v27, 1  ;;  %v495_v60 = vmin.f32 %v1817_v21, %v463_v24  ;;  %v1857_v37 = vsel %vm419_vm8, %v1615_v54, 1e+30  ;;  %v466_v38 = vrot.slane %v1847_v25, 1 }
  0x5b   :  { %v496_v63 = vmin.f32 %v1827_v23, %v464_v28  ;;  %v508_v53 = vrot.slane %v1787_v34, 2  ;;  %v1867_v12 = vsel %vm420_vm4, %v1618_v61, 1e+30  ;;  %v467_v0 = vrot.slane %v1857_v37, 1 }
  0x5c   :  { %2427 = vst [vmem:[#allocation10_spill] sm:$0xff] %v1867_v12  ;;  %v497_v13 = vmin.f32 %v1837_v27, %v465_v33  ;;  %v509_v54 = vrot.slane %v1797_v57, 2  ;;  %v1873_v39 = vsel %vm421_vm13, %v1621_v62, 1e+30  ;;  %v468_v40 = vrot.slane %v1867_v12, 1 }
  0x5d   :  { %2428 = vst [vmem:[#allocation11_spill] sm:$0xff] %v1873_v39  ;;  %v498_v43 = vmin.f32 %v1847_v25, %v466_v38  ;;  %v510_v10 = vrot.slane %v1807_v1, 2  ;;  %v469_v44 = vrot.slane %v1873_v39, 1  ;;  %v499_v61 = vmin.f32 %v1857_v37, %v467_v0 }
  0x5e   :  { %v511_v45 = vrot.slane %v1817_v21, 2  ;;  %v512_v14 = vrot.slane %v1827_v23, 2  ;;  %v500_v15 = vmin.f32 %v1867_v12, %v468_v40  ;;  %v513_v26 = vrot.slane %v1837_v27, 2 }
  0x5f   :  { %v514_v62 = vrot.slane %v1847_v25, 2  ;;  %v515_v31 = vrot.slane %v1857_v37, 2  ;;  %v501_v32 = vmin.f32 %v1873_v39, %v469_v44  ;;  %v516_v16 = vrot.slane %v1867_v12, 2 }
  0x60   :  { %v517_v18 = vrot.slane %v1873_v39, 2  ;;  %v534_v20 = vmin.f32 %v486_v17, %v502_v56  ;;  %v535_v59 = vmin.f32 %v487_v19, %v503_v41  ;;  %v536_v3 = vmin.f32 %v488_v35, %v504_v42 }
  0x61   :  { %v537_v24 = vmin.f32 %v489_v58, %v505_v51  ;;  %v538_v28 = vmin.f32 %v490_v50, %v506_v36  ;;  %v539_v33 = vmin.f32 %v491_v2, %v507_v52  ;;  %v540_v38 = vmin.f32 %v492_v22, %v508_v53 }
  0x62   :  { %v541_v0 = vmin.f32 %v493_v4, %v509_v54  ;;  %v542_v40 = vmin.f32 %v494_v29, %v510_v10  ;;  %v543_v11 = vmin.f32 %v495_v60, %v511_v45  ;;  %v544_v9 = vmin.f32 %v496_v63, %v512_v14 }
  0x63   :  { %v545_v7 = vmin.f32 %v497_v13, %v513_v26  ;;  %v546_v8 = vmin.f32 %v498_v43, %v514_v62  ;;  %v547_v6 = vmin.f32 %v499_v61, %v515_v31  ;;  %v548_v5 = vmin.f32 %v500_v15, %v516_v16  ;;  %v2429_v29 = vld [vmem:[#allocation10_spill] sm:$0xff] }
  0x64   :  { %v549_v44 = vmin.f32 %v501_v32, %v517_v18  ;;  %v550_v12 = vrot.slane %v1742_v46, 3  ;;  %v551_v39 = vrot.slane %v1745_v47, 3  ;;  %v552_v17 = vrot.slane %v1752_v48, 3  ;;  %v2430_v60 = vld [vmem:[#allocation11_spill] sm:$0xff] }
  0x65   :  { %v553_v56 = vrot.slane %v1755_v49, 3  ;;  %v554_v19 = vrot.slane %v1768_v30, 3  ;;  %v555_v35 = vrot.slane %v1777_v55, 3  ;;  %v556_v58 = vrot.slane %v1787_v34, 3 }
  0x66   :  { %v557_v50 = vrot.slane %v1797_v57, 3  ;;  %v558_v2 = vrot.slane %v1807_v1, 3  ;;  %v559_v41 = vrot.slane %v1817_v21, 3  ;;  %v560_v22 = vrot.slane %v1827_v23, 3 }
  0x67   :  { %v561_v42 = vrot.slane %v1837_v27, 3  ;;  %v562_v4 = vrot.slane %v1847_v25, 3  ;;  %v563_v51 = vrot.slane %v1857_v37, 3  ;;  %v564_v36 = vrot.slane %v2429_v29, 3 }
  0x68   :  { %v565_v52 = vrot.slane %v2430_v60, 3  ;;  %v582_v63 = vmin.f32 %v534_v20, %v550_v12  ;;  %v583_v53 = vmin.f32 %v535_v59, %v551_v39  ;;  %v584_v13 = vmin.f32 %v536_v3, %v552_v17 }
  0x69   :  { %v585_v54 = vmin.f32 %v537_v24, %v553_v56  ;;  %v586_v43 = vmin.f32 %v538_v28, %v554_v19  ;;  %v587_v10 = vmin.f32 %v539_v33, %v555_v35  ;;  %v588_v61 = vmin.f32 %v540_v38, %v556_v58  ;;  %v2431_v28 = vld [vmem:[#allocation10_spill] sm:$0xff]  ;;  %v2432_v38 = vld [vmem:[#allocation11_spill] sm:$0xff] }
  0x6a   :  { %v589_v45 = vmin.f32 %v541_v0, %v557_v50  ;;  %v590_v14 = vmin.f32 %v542_v40, %v558_v2  ;;  %v591_v15 = vmin.f32 %v543_v11, %v559_v41  ;;  %v592_v26 = vmin.f32 %v544_v9, %v560_v22 }
  0x6b   :  { %v593_v62 = vmin.f32 %v545_v7, %v561_v42  ;;  %v594_v31 = vmin.f32 %v546_v8, %v562_v4  ;;  %v595_v32 = vmin.f32 %v547_v6, %v563_v51  ;;  %v596_v16 = vmin.f32 %v548_v5, %v564_v36 }
  0x6c   :  { %v597_v18 = vmin.f32 %v549_v44, %v565_v52  ;;  %v598_v29 = vrot.slane %v1742_v46, 4  ;;  %v599_v60 = vrot.slane %v1745_v47, 4  ;;  %v600_v12 = vrot.slane %v1752_v48, 4 }
  0x6d   :  { %v601_v39 = vrot.slane %v1755_v49, 4  ;;  %v602_v20 = vrot.slane %v1768_v30, 4  ;;  %v603_v59 = vrot.slane %v1777_v55, 4  ;;  %v604_v11 = vrot.slane %v1787_v34, 4 }
  0x6e   :  { %v605_v7 = vrot.slane %v1797_v57, 4  ;;  %v606_v6 = vrot.slane %v1807_v1, 4  ;;  %v607_v5 = vrot.slane %v1817_v21, 4  ;;  %v608_v8 = vrot.slane %v1827_v23, 4 }
  0x6f   :  { %v609_v9 = vrot.slane %v1837_v27, 4  ;;  %v610_v3 = vrot.slane %v1847_v25, 4  ;;  %v611_v24 = vrot.slane %v1857_v37, 4  ;;  %v612_v33 = vrot.slane %v2431_v28, 4 }
  0x70   :  { %v613_v0 = vrot.slane %v2432_v38, 4  ;;  %v630_v40 = vmin.f32 %v582_v63, %v598_v29  ;;  %v631_v44 = vmin.f32 %v583_v53, %v599_v60  ;;  %v632_v17 = vmin.f32 %v584_v13, %v600_v12 }
  0x71   :  { %v633_v56 = vmin.f32 %v585_v54, %v601_v39  ;;  %v634_v19 = vmin.f32 %v586_v43, %v602_v20  ;;  %v635_v35 = vmin.f32 %v587_v10, %v603_v59  ;;  %v636_v58 = vmin.f32 %v588_v61, %v604_v11 }
  0x72   :  { %v637_v50 = vmin.f32 %v589_v45, %v605_v7  ;;  %v638_v2 = vmin.f32 %v590_v14, %v606_v6  ;;  %v639_v41 = vmin.f32 %v591_v15, %v607_v5  ;;  %v640_v22 = vmin.f32 %v592_v26, %v608_v8  ;;  %v2433_v26 = vld [vmem:[#allocation10_spill] sm:$0xff] }
  0x73   :  { %v641_v42 = vmin.f32 %v593_v62, %v609_v9  ;;  %v642_v4 = vmin.f32 %v594_v31, %v610_v3  ;;  %v643_v51 = vmin.f32 %v595_v32, %v611_v24  ;;  %v644_v36 = vmin.f32 %v596_v16, %v612_v33  ;;  %v2434_v31 = vld [vmem:[#allocation11_spill] sm:$0xff] }
  0x74   :  { %v645_v52 = vmin.f32 %v597_v18, %v613_v0  ;;  %v646_v28 = vrot.slane %v1742_v46, 5  ;;  %v647_v38 = vrot.slane %v1745_v47, 5  ;;  %v648_v29 = vrot.slane %v1752_v48, 5 }
  0x75   :  { %v649_v60 = vrot.slane %v1755_v49, 5  ;;  %v650_v63 = vrot.slane %v1768_v30, 5  ;;  %v651_v53 = vrot.slane %v1777_v55, 5  ;;  %v652_v13 = vrot.slane %v1787_v34, 5 }
  0x76   :  { %v653_v54 = vrot.slane %v1797_v57, 5  ;;  %v654_v43 = vrot.slane %v1807_v1, 5  ;;  %v655_v10 = vrot.slane %v1817_v21, 5  ;;  %v656_v61 = vrot.slane %v1827_v23, 5 }
  0x77   :  { %v657_v45 = vrot.slane %v1837_v27, 5  ;;  %v658_v14 = vrot.slane %v1847_v25, 5  ;;  %v659_v15 = vrot.slane %v1857_v37, 5  ;;  %v660_v62 = vrot.slane %v2433_v26, 5 }
  0x78   :  { %v661_v32 = vrot.slane %v2434_v31, 5  ;;  %v678_v16 = vmin.f32 %v630_v40, %v646_v28  ;;  %v679_v18 = vmin.f32 %v631_v44, %v647_v38  ;;  %v680_v12 = vmin.f32 %v632_v17, %v648_v29 }
  0x79   :  { %v681_v39 = vmin.f32 %v633_v56, %v649_v60  ;;  %v682_v20 = vmin.f32 %v634_v19, %v650_v63  ;;  %v683_v59 = vmin.f32 %v635_v35, %v651_v53  ;;  %v684_v11 = vmin.f32 %v636_v58, %v652_v13 }
  0x7a   :  { %v685_v7 = vmin.f32 %v637_v50, %v653_v54  ;;  %v686_v6 = vmin.f32 %v638_v2, %v654_v43  ;;  %v687_v5 = vmin.f32 %v639_v41, %v655_v10  ;;  %v688_v8 = vmin.f32 %v640_v22, %v656_v61  ;;  %v2435_v22 = vld [vmem:[#allocation10_spill] sm:$0xff] }
  0x7b   :  { %v689_v9 = vmin.f32 %v641_v42, %v657_v45  ;;  %v690_v3 = vmin.f32 %v642_v4, %v658_v14  ;;  %v691_v24 = vmin.f32 %v643_v51, %v659_v15  ;;  %v692_v33 = vmin.f32 %v644_v36, %v660_v62  ;;  %v2436_v4 = vld [vmem:[#allocation11_spill] sm:$0xff] }
  0x7c   :  { %v693_v0 = vmin.f32 %v645_v52, %v661_v32  ;;  %v694_v26 = vrot.slane %v1742_v46, 6  ;;  %v695_v31 = vrot.slane %v1745_v47, 6  ;;  %v696_v28 = vrot.slane %v1752_v48, 6 }
  0x7d   :  { %v697_v38 = vrot.slane %v1755_v49, 6  ;;  %v698_v40 = vrot.slane %v1768_v30, 6  ;;  %v699_v44 = vrot.slane %v1777_v55, 6  ;;  %v700_v17 = vrot.slane %v1787_v34, 6 }
  0x7e   :  { %v701_v56 = vrot.slane %v1797_v57, 6  ;;  %v702_v19 = vrot.slane %v1807_v1, 6  ;;  %v703_v35 = vrot.slane %v1817_v21, 6  ;;  %v704_v58 = vrot.slane %v1827_v23, 6 }
  0x7f   :  { %v705_v50 = vrot.slane %v1837_v27, 6  ;;  %v706_v2 = vrot.slane %v1847_v25, 6  ;;  %v707_v41 = vrot.slane %v1857_v37, 6  ;;  %v708_v42 = vrot.slane %v2435_v22, 6 }
  0x80   :  { %v709_v51 = vrot.slane %v2436_v4, 6  ;;  %v726_v36 = vmin.f32 %v678_v16, %v694_v26  ;;  %v727_v52 = vmin.f32 %v679_v18, %v695_v31  ;;  %v728_v29 = vmin.f32 %v680_v12, %v696_v28 }
  0x81   :  { %v729_v60 = vmin.f32 %v681_v39, %v697_v38  ;;  %v730_v63 = vmin.f32 %v682_v20, %v698_v40  ;;  %v731_v53 = vmin.f32 %v683_v59, %v699_v44  ;;  %v732_v13 = vmin.f32 %v684_v11, %v700_v17 }
  0x82   :  { %v733_v54 = vmin.f32 %v685_v7, %v701_v56  ;;  %v734_v43 = vmin.f32 %v686_v6, %v702_v19  ;;  %v735_v10 = vmin.f32 %v687_v5, %v703_v35  ;;  %v736_v61 = vmin.f32 %v688_v8, %v704_v58  ;;  %v2437_v8 = vld [vmem:[#allocation10_spill] sm:$0xff] }
  0x83   :  { %v737_v45 = vmin.f32 %v689_v9, %v705_v50  ;;  %v738_v14 = vmin.f32 %v690_v3, %v706_v2  ;;  %v739_v15 = vmin.f32 %v691_v24, %v707_v41  ;;  %v740_v62 = vmin.f32 %v692_v33, %v708_v42  ;;  %v2438_v3 = vld [vmem:[#allocation11_spill] sm:$0xff] }
  0x84   :  { %v741_v32 = vmin.f32 %v693_v0, %v709_v51  ;;  %v742_v22 = vrot.slane %v1742_v46, 7  ;;  %v743_v4 = vrot.slane %v1745_v47, 7  ;;  %v744_v26 = vrot.slane %v1752_v48, 7 }
  0x85   :  { %v745_v31 = vrot.slane %v1755_v49, 7  ;;  %v746_v16 = vrot.slane %v1768_v30, 7  ;;  %v747_v18 = vrot.slane %v1777_v55, 7  ;;  %v748_v12 = vrot.slane %v1787_v34, 7 }
  0x86   :  { %v749_v39 = vrot.slane %v1797_v57, 7  ;;  %v750_v20 = vrot.slane %v1807_v1, 7  ;;  %v751_v59 = vrot.slane %v1817_v21, 7  ;;  %v752_v11 = vrot.slane %v1827_v23, 7 }
  0x87   :  { %v753_v7 = vrot.slane %v1837_v27, 7  ;;  %v754_v6 = vrot.slane %v1847_v25, 7  ;;  %v755_v5 = vrot.slane %v1857_v37, 7  ;;  %v756_v9 = vrot.slane %v2437_v8, 7 }
  0x88   :  { %v757_v24 = vrot.slane %v2438_v3, 7  ;;  %v774_v33 = vmin.f32 %v726_v36, %v742_v22  ;;  %v1969_v0 = vmin.f32 %v727_v52, %v743_v4  ;;  %v776_v28 = vmin.f32 %v728_v29, %v744_v26 }
  0x89   :  { %v1971_v38 = vmin.f32 %v729_v60, %v745_v31  ;;  %v778_v40 = vmin.f32 %v730_v63, %v746_v16  ;;  %v1973_v44 = vmin.f32 %v731_v53, %v747_v18  ;;  %v1975_v17 = vmin.f32 %v732_v13, %v748_v12 }
  0x8a   :  { %v1977_v56 = vmin.f32 %v733_v54, %v749_v39  ;;  %v1979_v19 = vmin.f32 %v734_v43, %v750_v20  ;;  %v1981_v35 = vmin.f32 %v735_v10, %v751_v59  ;;  %v1983_v58 = vmin.f32 %v736_v61, %v752_v11 }
  0x8b   :  { %v1985_v50 = vmin.f32 %v737_v45, %v753_v7  ;;  %v1987_v2 = vmin.f32 %v738_v14, %v754_v6  ;;  %v1989_v41 = vmin.f32 %v739_v15, %v755_v5  ;;  %v1991_v22 = vmin.f32 %v740_v62, %v756_v9 }
  0x8c   :  { %v1993_v42 = vmin.f32 %v741_v32, %v757_v24  ;;  %vm2376_vm0 = vcmask 1040384   ;;  %v1348_v9 = vmov 8  }
  0x8d   :  { %v791_v4 = vsel %vm2376_vm0, %v774_v33, inf  ;;  %v792_v51 = vsel %vm2376_vm0, %v776_v28, inf  ;;  %v793_v36 = vsel %vm2376_vm0, %v778_v40, inf  ;;  %v795_v52 = vsel %vm2376_vm0, %v1975_v17, inf }
  0x8e   :  { %v794_v29 = vmin.f32 %v791_v4, %v793_v36  ;;  %v796_v60 = vmin.f32 %v792_v51, %v795_v52  ;;  %v797_v63 = vsel %vm2376_vm0, %v1979_v19, inf  ;;  %v799_v53 = vsel %vm2376_vm0, %v1983_v58, inf }
  0x8f   :  { %v801_v13 = vsel %vm2376_vm0, %v1987_v2, inf  ;;  %v803_v54 = vsel %vm2376_vm0, %v1991_v22, inf  ;;  %v806_v43 = vsel %vm2376_vm0, %v1969_v0, inf  ;;  %v807_v10 = vsel %vm2376_vm0, %v1971_v38, inf }
  0x90   :  { %v798_v61 = vmin.f32 %v794_v29, %v797_v63  ;;  %v800_v45 = vmin.f32 %v796_v60, %v799_v53  ;;  %v808_v14 = vsel %vm2376_vm0, %v1973_v44, inf  ;;  %v810_v15 = vsel %vm2376_vm0, %v1977_v56, inf }
  0x91   :  { %v809_v62 = vmin.f32 %v806_v43, %v808_v14  ;;  %v811_v32 = vmin.f32 %v807_v10, %v810_v15  ;;  %v812_v26 = vsel %vm2376_vm0, %v1981_v35, inf  ;;  %v814_v31 = vsel %vm2376_vm0, %v1985_v50, inf }
  0x92   :  { %v802_v16 = vmin.f32 %v798_v61, %v801_v13  ;;  %v804_v18 = vmin.f32 %v800_v45, %v803_v54  ;;  %v816_v12 = vsel %vm2376_vm0, %v1989_v41, inf  ;;  %v818_v39 = vsel %vm2376_vm0, %v1993_v42, inf }
  0x93   :  { %v813_v20 = vmin.f32 %v809_v62, %v812_v26  ;;  %v815_v59 = vmin.f32 %v811_v32, %v814_v31 }
  0x94   :  { %v2024_v11 = vmin.f32 %v802_v16, %v804_v18 }
  0x95   :  { %v817_v7 = vmin.f32 %v813_v20, %v816_v12  ;;  %v819_v6 = vmin.f32 %v815_v59, %v818_v39 }
  0x96   :  { %vm821_vm2 = vcmp.le.f32.partialorder %v774_v33, %v2024_v11  ;;  %vm823_vm15 = vcmp.le.f32.partialorder %v776_v28, %v2024_v11  ;;  %vm825_vm7 = vcmp.le.f32.partialorder %v778_v40, %v2024_v11  ;;  %vm827_vm10 = vcmp.le.f32.partialorder %v1975_v17, %v2024_v11 }
  0x97   :  { %v2031_v5 = vmin.f32 %v817_v7, %v819_v6  ;;  %vm829_vm11 = vcmp.le.f32.partialorder %v1979_v19, %v2024_v11  ;;  %vm831_vm14 = vcmp.le.f32.partialorder %v1983_v58, %v2024_v11  ;;  %vm833_vm12 = vcmp.le.f32.partialorder %v1987_v2, %v2024_v11 }
  0x98   :  { %vm835_vm3 = vcmp.le.f32.partialorder %v1991_v22, %v2024_v11  ;;  %v837_v24 = vsel %vm821_vm2, 0, %v1348_v9  ;;  %v839_v33 = vsel %vm823_vm15, 1, %v1348_v9  ;;  %v847_v40 = vsel %vm831_vm14, 5, %v1348_v9 }
  0x99   :  { %vm822_vm5 = vcmp.le.f32.partialorder %v1969_v0, %v2031_v5  ;;  %vm824_vm6 = vcmp.le.f32.partialorder %v1971_v38, %v2031_v5  ;;  %vm826_vm9 = vcmp.le.f32.partialorder %v1973_v44, %v2031_v5  ;;  %vm828_vm1 = vcmp.le.f32.partialorder %v1977_v56, %v2031_v5 }
  0x9a   :  { %vm830_vm8 = vcmp.le.f32.partialorder %v1981_v35, %v2031_v5  ;;  %vm832_vm4 = vcmp.le.f32.partialorder %v1985_v50, %v2031_v5  ;;  %vm834_vm13 = vcmp.le.f32.partialorder %v1989_v41, %v2031_v5  ;;  %v841_v0 = vsel %vm825_vm7, 2, %v1348_v9 }
  0x9b   :  { %vm836_vm2 = vcmp.le.f32.partialorder %v1993_v42, %v2031_v5  ;;  %v838_v28 = vsel %vm822_vm5, 0, %v1348_v9  ;;  %v840_v38 = vsel %vm824_vm6, 1, %v1348_v9  ;;  %v842_v44 = vsel %vm826_vm9, 2, %v1348_v9 }
  0x9c   :  { %v843_v56 = vsel %vm827_vm10, 3, %v1348_v9  ;;  %v844_v35 = vsel %vm828_vm1, 3, %v1348_v9  ;;  %v845_v50 = vsel %vm829_vm11, 4, %v1348_v9  ;;  %v846_v4 = vsel %vm830_vm8, 4, %v1348_v9 }
  0x9d   :  { %v848_v41 = vsel %vm832_vm4, 5, %v1348_v9  ;;  %v849_v42 = vsel %vm833_vm12, 6, %v1348_v9  ;;  %v850_v51 = vsel %vm834_vm13, 6, %v1348_v9  ;;  %v851_v17 = vsel %vm835_vm3, 7, %v1348_v9 }
  0x9e   :  { %v852_v36 = vsel %vm836_vm2, 7, %v1348_v9  ;;  %v853_v52 = vsel %vm2376_vm0, %v837_v24, 2147483647  ;;  %v854_v19 = vsel %vm2376_vm0, %v839_v33, 2147483647  ;;  %v2439_v9 = vmov 0  }
  0x9f   :  { %v855_v29 = vsel %vm2376_vm0, %v841_v0, 2147483647  ;;  %v858_v58 = vsel %vm2376_vm0, %v843_v56, 2147483647  ;;  %v861_v60 = vsel %vm2376_vm0, %v845_v50, 2147483647 }
  0xa0   :  { %vm856_vm15 = vcmp.lt.s32.totalorder %v853_v52, %v855_v29  ;;  %vm859_vm7 = vcmp.lt.s32.totalorder %v854_v19, %v858_v58  ;;  %v864_v2 = vsel %vm2376_vm0, %v847_v40, 2147483647  ;;  %v867_v63 = vsel %vm2376_vm0, %v849_v42, 2147483647 }
  0xa1   :  { %v857_v53 = vsel %vm856_vm15, %v853_v52, %v855_v29  ;;  %v860_v22 = vsel %vm859_vm7, %v854_v19, %v858_v58  ;;  %v870_v13 = vsel %vm2376_vm0, %v851_v17, 2147483647  ;;  %v875_v54 = vsel %vm2376_vm0, %v838_v28, 2147483647 }
  0xa2   :  { %vm862_vm10 = vcmp.lt.s32.totalorder %v857_v53, %v861_v60  ;;  %vm865_vm11 = vcmp.lt.s32.totalorder %v860_v22, %v864_v2  ;;  %v876_v43 = vsel %vm2376_vm0, %v840_v38, 2147483647  ;;  %v877_v10 = vsel %vm2376_vm0, %v842_v44, 2147483647 }
  0xa3   :  { %v863_v61 = vsel %vm862_vm10, %v857_v53, %v861_v60  ;;  %v866_v45 = vsel %vm865_vm11, %v860_v22, %v864_v2  ;;  %vm878_vm14 = vcmp.lt.s32.totalorder %v875_v54, %v877_v10  ;;  %v880_v14 = vsel %vm2376_vm0, %v844_v35, 2147483647 }
  0xa4   :  { %vm868_vm12 = vcmp.lt.s32.totalorder %v863_v61, %v867_v63  ;;  %vm871_vm3 = vcmp.lt.s32.totalorder %v866_v45, %v870_v13  ;;  %v879_v15 = vsel %vm878_vm14, %v875_v54, %v877_v10  ;;  %vm881_vm5 = vcmp.lt.s32.totalorder %v876_v43, %v880_v14 }
  0xa5   :  { %v869_v62 = vsel %vm868_vm12, %v863_v61, %v867_v63  ;;  %v872_v32 = vsel %vm871_vm3, %v866_v45, %v870_v13  ;;  %v882_v26 = vsel %vm881_vm5, %v876_v43, %v880_v14  ;;  %v883_v31 = vsel %vm2376_vm0, %v846_v4, 2147483647 }
  0xa6   :  { %vm873_vm6 = vcmp.lt.s32.totalorder %v869_v62, %v872_v32  ;;  %vm884_vm9 = vcmp.lt.s32.totalorder %v879_v15, %v883_v31  ;;  %v886_v16 = vsel %vm2376_vm0, %v848_v41, 2147483647  ;;  %v889_v18 = vsel %vm2376_vm0, %v850_v51, 2147483647 }
  0xa7   :  { %v874_v12 = vsel %vm873_vm6, %v869_v62, %v872_v32  ;;  %v885_v39 = vsel %vm884_vm9, %v879_v15, %v883_v31  ;;  %vm887_vm1 = vcmp.lt.s32.totalorder %v882_v26, %v886_v16  ;;  %v892_v20 = vsel %vm2376_vm0, %v852_v36, 2147483647  ;;  %v2476_v62 = vld [vmem:[#allocation7_spill] sm:$0xff] }
  0xa8   :  { %v888_v59 = vsel %vm887_vm1, %v882_v26, %v886_v16  ;;  %vm890_vm8 = vcmp.lt.s32.totalorder %v885_v39, %v889_v18  ;;  %vm897_vm4 = vcmp.eq.s32.totalorder %v874_v12, 0  ;;  %vm899_vm13 = vcmp.eq.s32.totalorder %v874_v12, 1 }
  0xa9   :  { %v891_v7 = vsel %vm890_vm8, %v885_v39, %v889_v18  ;;  %vm893_vm2 = vcmp.lt.s32.totalorder %v888_v59, %v892_v20  ;;  %vm901_vm15 = vcmp.eq.s32.totalorder %v874_v12, 2  ;;  %vm903_vm7 = vcmp.eq.s32.totalorder %v874_v12, 3 }
  0xaa   :  { %v894_v6 = vsel %vm893_vm2, %v888_v59, %v892_v20  ;;  %vm905_vm10 = vcmp.eq.s32.totalorder %v874_v12, 4  ;;  %vm909_vm12 = vcmp.eq.s32.totalorder %v874_v12, 6  ;;  %vm911_vm3 = vcmp.eq.s32.totalorder %v874_v12, 7 }
  0xab   :  { %vm895_vm14 = vcmp.lt.s32.totalorder %v891_v7, %v894_v6  ;;  %v913_v24 = vsel %vm897_vm4, 1, %v2439_v9  ;;  %v915_v0 = vsel %vm899_vm13, 1, %v2439_v9  ;;  %v917_v28 = vsel %vm901_vm15, 1, %v2439_v9 }
  0xac   :  { %v896_v33 = vsel %vm895_vm14, %v891_v7, %v894_v6  ;;  %v919_v38 = vsel %vm903_vm7, 1, %v2439_v9  ;;  %v921_v50 = vsel %vm905_vm10, 1, %v2439_v9  ;;  %vm2440_vm4 = vcmp.eq.s32.totalorder %v874_v12, 5 }
  0xad   :  { %vm898_vm5 = vcmp.eq.s32.totalorder %v896_v33, 0  ;;  %vm900_vm6 = vcmp.eq.s32.totalorder %v896_v33, 1  ;;  %vm902_vm9 = vcmp.eq.s32.totalorder %v896_v33, 2  ;;  %vm904_vm1 = vcmp.eq.s32.totalorder %v896_v33, 3 }
  0xae   :  { %vm906_vm8 = vcmp.eq.s32.totalorder %v896_v33, 4  ;;  %vm908_vm2 = vcmp.eq.s32.totalorder %v896_v33, 5  ;;  %vm910_vm0 = vcmp.eq.s32.totalorder %v896_v33, 6  ;;  %vm912_vm11 = vcmp.eq.s32.totalorder %v896_v33, 7 }
  0xaf   :  { %v914_v44 = vsel %vm898_vm5, 1, %v2439_v9  ;;  %v916_v56 = vsel %vm900_vm6, 1, %v2439_v9  ;;  %v918_v35 = vsel %vm902_vm9, 1, %v2439_v9  ;;  %v920_v4 = vsel %vm904_vm1, 1, %v2439_v9 }
  0xb0   :  { %v922_v40 = vsel %vm906_vm8, 1, %v2439_v9  ;;  %v923_v41 = vsel %vm2440_vm4, 1, %v2439_v9  ;;  %v924_v42 = vsel %vm908_vm2, 1, %v2439_v9  ;;  %v925_v51 = vsel %vm909_vm12, 1, %v2439_v9 }
  0xb1   :  { %v926_v17 = vsel %vm910_vm0, 1, %v2439_v9  ;;  %v927_v36 = vsel %vm911_vm3, 1, %v2439_v9  ;;  %v928_v52 = vsel %vm912_vm11, 1, %v2439_v9  ;;  %v929_v19 = vperm.slane %v913_v24, 0  ;;  %v1315_v9 = vld [vmem:[%s2362_s3] sm:$0xff] }
  0xb2   :  { %v930_v29 = vperm.slane %v914_v44, 0  ;;  %v931_v58 = vperm.slane %v915_v0, 0  ;;  %v932_v60 = vperm.slane %v916_v56, 0  ;;  %v933_v2 = vperm.slane %v917_v28, 0 }
  0xb3   :  { %v934_v63 = vperm.slane %v918_v35, 0  ;;  %v935_v53 = vperm.slane %v919_v38, 0  ;;  %v936_v22 = vperm.slane %v920_v4, 0  ;;  %v937_v13 = vperm.slane %v921_v50, 0 }
  0xb4   :  { %v938_v54 = vperm.slane %v922_v40, 0  ;;  %v939_v43 = vperm.slane %v923_v41, 0  ;;  %v940_v10 = vperm.slane %v924_v42, 0  ;;  %v941_v61 = vperm.slane %v925_v51, 0 }
  0xb5   :  { %v942_v45 = vperm.slane %v926_v17, 0  ;;  %v943_v14 = vperm.slane %v927_v36, 0  ;;  %v944_v15 = vperm.slane %v928_v52, 0  ;;  %vm2110_vm0 = vcmp.eq.s32.totalorder %v929_v19, 1 }
  0xb6   :  { %vm2114_vm13 = vcmp.eq.s32.totalorder %v930_v29, 1  ;;  %vm2118_vm15 = vcmp.eq.s32.totalorder %v931_v58, 1  ;;  %vm2122_vm7 = vcmp.eq.s32.totalorder %v932_v60, 1  ;;  %vm2126_vm10 = vcmp.eq.s32.totalorder %v933_v2, 1 }
  0xb7   :  { %vm2130_vm11 = vcmp.eq.s32.totalorder %v934_v63, 1  ;;  %vm2134_vm14 = vcmp.eq.s32.totalorder %v935_v53, 1  ;;  %vm2138_vm12 = vcmp.eq.s32.totalorder %v936_v22, 1  ;;  %vm2142_vm3 = vcmp.eq.s32.totalorder %v937_v13, 1 }
  0xb8   :  { %vm2146_vm5 = vcmp.eq.s32.totalorder %v938_v54, 1  ;;  %vm2150_vm6 = vcmp.eq.s32.totalorder %v939_v43, 1  ;;  %vm2154_vm9 = vcmp.eq.s32.totalorder %v940_v10, 1  ;;  %vm2158_vm1 = vcmp.eq.s32.totalorder %v941_v61, 1  ;;  %v2474_v10 = vld [vmem:[#allocation6_spill] sm:$0xff] }
  0xb9   :  { %vm2162_vm8 = vcmp.eq.s32.totalorder %v942_v45, 1  ;;  %vm2166_vm2 = vcmp.eq.s32.totalorder %v943_v14, 1  ;;  %v2469_v33 = vmov 0  ;;  %v961_v0 = vsel %vm2110_vm0, %v1742_v46, 1e+30  ;;  %v2475_v14 = vld [vmem:[#allocation8_spill] sm:$0xff] }
  0xba   :  { %v2470_v33 = vsel %vm2166_vm2, 4294967295, %v2469_v33  ;;  %v962_v28 = vsel %vm2114_vm13, %v1745_v47, 1e+30  ;;  %v963_v38 = vsel %vm2118_vm15, %v1752_v48, 1e+30  ;;  %vm2191_vm4 = vcmp.eq.s32.totalorder %v944_v15, 1 }
  0xbb   :  { %v964_v44 = vsel %vm2122_vm7, %v1755_v49, 1e+30  ;;  %v965_v56 = vsel %vm2126_vm10, %v1768_v30, 1e+30  ;;  %v966_v46 = vsel %vm2130_vm11, %v1777_v55, 1e+30 }
  0xbc   :  { %v967_v47 = vsel %vm2134_vm14, %v1787_v34, 1e+30  ;;  %v2471_v35 = vmov 0  ;;  %v968_v48 = vsel %vm2138_vm12, %v1797_v57, 1e+30  ;;  %v977_v30 = vmin.f32 %v961_v0, %v965_v56 }
  0xbd   :  { %v2472_v35 = vsel %vm2191_vm4, 4294967295, %v2471_v35  ;;  %v969_v49 = vsel %vm2142_vm3, %v1807_v1, 1e+30  ;;  %v970_v55 = vsel %vm2146_vm5, %v1817_v21, 1e+30  ;;  %v978_v4 = vmin.f32 %v963_v38, %v967_v47 }
  0xbe   :  { %v971_v34 = vsel %vm2150_vm6, %v1827_v23, 1e+30  ;;  %v973_v50 = vsel %vm2158_vm1, %v1847_v25, 1e+30  ;;  %v972_v57 = vsel %vm2154_vm9, %v1837_v27, 1e+30  ;;  %v979_v40 = vmin.f32 %v977_v30, %v969_v49 }
  0xbf   :  { %v974_v1 = vsel %vm2162_vm8, %v1857_v37, 1e+30  ;;  %v975_v21 = vsel %vm2166_vm2, %v2437_v8, 1e+30  ;;  %v976_v23 = vsel %vm2191_vm4, %v2438_v3, 1e+30  ;;  %v980_v41 = vmin.f32 %v978_v4, %v971_v34 }
  0xc0   :  { %v984_v25 = vmin.f32 %v962_v28, %v966_v46  ;;  %v985_v42 = vmin.f32 %v964_v44, %v968_v48  ;;  %v1016_v51 = vld.sshfl [vmem:[#allocation1] sm:$0xff pattern:$0x75316420]  ;;  %v981_v17 = vmin.f32 %v979_v40, %v973_v50  ;;  %v991_v27 = vperm.slane %v2024_v11, 0  ;;  %v2473_v11 = vld [vmem:[#allocation5_spill] sm:$0xff] }
  0xc1   :  { %v992_v36 = vperm.slane %v2031_v5, 0  ;;  %v1017_v52 = vld.sshfl [vmem:[#allocation1 + $0x8] sm:$0xff pattern:$0x75316420]  ;;  %v1058_v37 = vsel %vm2110_vm0, %v1016_v51, 0.0  ;;  %v982_v19 = vmin.f32 %v980_v41, %v975_v21  ;;  %v2477_v28 = vld [vmem:[#allocation9_spill] sm:$0xff] }
  0xc2   :  { %v986_v8 = vmin.f32 %v984_v25, %v970_v55  ;;  %v987_v29 = vmin.f32 %v985_v42, %v972_v57  ;;  %v1020_v58 = vld.sshfl [vmem:[#allocation1 + $0x10] sm:$0xff pattern:$0x75316420]  ;;  %v1021_v60 = vld.sshfl [vmem:[#allocation1 + $0x18] sm:$0xff pattern:$0x75316420] }
  0xc3   :  { %v1024_v3 = vld.sshfl [vmem:[#allocation1 + $0x20] sm:$0xff pattern:$0x75316420]  ;;  %v983_v2 = vmin.f32 %v981_v17, %v982_v19  ;;  %v1025_v22 = vld.sshfl [vmem:[#allocation1 + $0x28] sm:$0xff pattern:$0x75316420] }
  0xc4   :  { %v988_v63 = vmin.f32 %v986_v8, %v974_v1  ;;  %v989_v53 = vmin.f32 %v987_v29, %v976_v23  ;;  %v1028_v13 = vld.sshfl [vmem:[#allocation1 + $0x30] sm:$0xff pattern:$0x75316420]  ;;  %v1029_v54 = vld.sshfl [vmem:[#allocation1 + $0x38] sm:$0xff pattern:$0x75316420] }
  0xc5   :  { %1030 = vst [vmem:[#allocation1] ss:$2 sm:$0xff] %v2473_v11  ;;  %v1060_v5 = vsel %vm2118_vm15, %v1020_v58, 0.0  ;;  %vm993_vm0 = vcmp.le.f32.partialorder %v983_v2, %v991_v27  ;;  %v1059_v61 = vsel %vm2114_vm13, %v1017_v52, 0.0  ;;  %v1061_v45 = vsel %vm2122_vm7, %v1021_v60, 0.0 }
  0xc6   :  { %v990_v43 = vmin.f32 %v988_v63, %v989_v53  ;;  %1033 = vst [vmem:[#allocation1 + $0x10] ss:$2 sm:$0xff] %v2474_v10  ;;  %v995_v15 = vsel %vm993_vm0, %v2475_v14, 8  ;;  %vm2478_vm4 = vcmask 1042432   ;;  %v1062_v32 = vsel %vm2126_vm10, %v1024_v3, 0.0  ;;  %v1318_v10 = vld [vmem:[%s2362_s3 + $0x18] sm:$0xff] }
  0xc7   :  { %1036 = vst [vmem:[#allocation1 + $0x20] ss:$2 sm:$0xff] %v2476_v62  ;;  %v997_v0 = vrot.slane %v995_v15, 4  ;;  %v1075_v26 = vsel %vm2478_vm4, %v1058_v37, 0.0  ;;  %vm2479_vm15 = vmmov %vm2478_vm4  ;;  %v1063_v47 = vsel %vm2130_vm11, %v1025_v22, 0.0  ;;  %v1064_v49 = vsel %vm2134_vm14, %v1028_v13, 0.0 }
  0xc8   :  { %vm994_vm2 = vcmp.le.f32.partialorder %v990_v43, %v992_v36  ;;  %1039 = vst [vmem:[#allocation1 + $0x30] ss:$2 sm:$0xff] %v2477_v28  ;;  %v1076_v38 = vsel %vm2479_vm15, %v1060_v5, 0.0  ;;  %vm2480_vm13 = vmmov %vm2478_vm4  ;;  %v1065_v4 = vsel %vm2138_vm12, %v1029_v54, 0.0 }
  0xc9   :  { %v996_v44 = vsel %vm994_vm2, %v2475_v14, 8  ;;  %v1090_v31 = vsel %vm2480_vm13, %v1059_v61, 0.0  ;;  %vm2481_vm7 = vmmov %vm2478_vm4  ;;  %vm998_vm0 = vcmp.lt.s32.totalorder %v995_v15, %v997_v0  ;;  %v1077_v30 = vadd.f32 %v1076_v38, %v1075_v26  ;;  %v1319_v38 = vld [vmem:[%s2362_s3 + $0x20] sm:$0xff] }
  0xca   :  { %v1091_v56 = vsel %vm2481_vm7, %v1061_v45, 0.0  ;;  %v1006_v46 = vrot.slane %v996_v44, 4  ;;  %v999_v48 = vsel %vm998_vm0, %v995_v15, %v997_v0  ;;  %vm2482_vm2 = vmmov %vm2481_vm7 }
  0xcb   :  { %v1000_v55 = vrot.slane %v999_v48, 2  ;;  %v1078_v34 = vsel %vm2482_vm2, %v1062_v32, 0.0  ;;  %v1092_v16 = vadd.f32 %v1091_v56, %v1090_v31  ;;  %vm2483_vm10 = vmmov %vm2482_vm2  ;;  %v1320_v32 = vld [vmem:[%s2362_s3 + $0x28] sm:$0xff] }
  0xcc   :  { %vm1007_vm4 = vcmp.lt.s32.totalorder %v996_v44, %v1006_v46  ;;  %v1093_v57 = vsel %vm2483_vm10, %v1063_v47, 0.0  ;;  %vm2484_vm13 = vmmov %vm2482_vm2  ;;  %v1031_v40 = vld.sshfl [vmem:[#allocation1] sm:$0xff pattern:$0x75316420]  ;;  %v1079_v23 = vadd.f32 %v1078_v34, %v1077_v30 }
  0xcd   :  { %v1008_v50 = vsel %vm1007_vm4, %v996_v44, %v1006_v46  ;;  %vm1001_vm15 = vcmp.lt.s32.totalorder %v999_v48, %v1000_v55  ;;  %v1080_v18 = vsel %vm2484_vm13, %v1064_v49, 0.0  ;;  %v1032_v12 = vld.sshfl [vmem:[#allocation1 + $0x8] sm:$0xff pattern:$0x75316420]  ;;  %v1094_v42 = vadd.f32 %v1093_v57, %v1092_v16  ;;  %vm2485_vm14 = vmmov %vm2482_vm2 }
  0xce   :  { %v1009_v1 = vrot.slane %v1008_v50, 2  ;;  %v1002_v21 = vsel %vm1001_vm15, %v999_v48, %v1000_v55  ;;  %v1034_v25 = vld.sshfl [vmem:[#allocation1 + $0x10] sm:$0xff pattern:$0x75316420]  ;;  %v1095_v51 = vsel %vm2485_vm14, %v1065_v4, 0.0  ;;  %v1066_v8 = vsel %vm2142_vm3, %v1031_v40, 0.0  ;;  %vm2487_vm0 = vmmov %vm2482_vm2 }
  0xcf   :  { %v1003_v41 = vrot.slane %v1002_v21, 1  ;;  %v1035_v27 = vld.sshfl [vmem:[#allocation1 + $0x18] sm:$0xff pattern:$0x75316420]  ;;  %v1081_v29 = vadd.f32 %v1080_v18, %v1079_v23  ;;  %v1067_v60 = vsel %vm2146_vm5, %v1032_v12, 0.0  ;;  %v1068_v3 = vsel %vm2150_vm6, %v1034_v25, 0.0  ;;  %vm2492_vm2 = vmmov %vm2487_vm0 }
  0xd0   :  { %vm1010_vm11 = vcmp.lt.s32.totalorder %v1008_v50, %v1009_v1  ;;  %v1037_v39 = vld.sshfl [vmem:[#allocation1 + $0x20] sm:$0xff pattern:$0x75316420]  ;;  %v1038_v52 = vld.sshfl [vmem:[#allocation1 + $0x28] sm:$0xff pattern:$0x75316420]  ;;  %v1096_v2 = vadd.f32 %v1095_v51, %v1094_v42  ;;  %vm2486_vm3 = vnez %v2470_v33  ;;  %vm2488_vm4 = vnez %v2472_v35  ;;  %vm2493_vm10 = vmmov %vm2487_vm0 }
  0xd1   :  { %v1011_v17 = vsel %vm1010_vm11, %v1008_v50, %v1009_v1  ;;  %vm1004_vm12 = vcmp.lt.s32.totalorder %v1002_v21, %v1003_v41  ;;  %v2254_v19 = vld.sshfl [vmem:[#allocation1 + $0x30] sm:$0xff pattern:$0x75316420]  ;;  %v2258_v58 = vld.sshfl [vmem:[#allocation1 + $0x38] sm:$0xff pattern:$0x75316420]  ;;  %vm2494_vm15 = vmmov %vm2487_vm0 }
  0xd2   :  { %v1012_v36 = vrot.slane %v1011_v17, 1  ;;  %v1005_v37 = vsel %vm1004_vm12, %v1002_v21, %v1003_v41  ;;  %v1069_v53 = vsel %vm2154_vm9, %v1035_v27, 0.0  ;;  %v1070_v22 = vsel %vm2158_vm1, %v1037_v39, 0.0  ;;  %vm2489_vm9 = vmmov %vm2487_vm0  ;;  %v1316_v33 = vld [vmem:[%s2362_s3 + $0x8] sm:$0xff]  ;;  %v1317_v35 = vld [vmem:[%s2362_s3 + $0x10] sm:$0xff]  ;;  %s1349_s3 = smov [#allocation2]  }
  0xd3   :  { %v1071_v20 = vsel %vm2162_vm8, %v1038_v52, 0.0  ;;  %v1072_v13 = vsel %vm2486_vm3, %v2254_v19, 0.0  ;;  %v1082_v59 = vsel %vm2487_vm0, %v1066_v8, 0.0  ;;  %vm1105_vm5 = vcmp.eq.s32.totalorder %v2475_v14, %v1005_v37  ;;  %vm2490_vm1 = vmmov %vm2487_vm0  ;;  %s1288_s30 = sshll.u32 %s1349_s3, 4  ;;  %s1289_s30 = int_to_ptr.vmem [resolvable:$true] %s1288_s30 }
  0xd4   :  { %vm1013_vm7 = vcmp.lt.s32.totalorder %v1011_v17, %v1012_v36  ;;  %v1073_v7 = vsel %vm2488_vm4, %v2258_v58, 0.0  ;;  %v1097_v6 = vsel %vm2489_vm9, %v1067_v60, 0.0  ;;  %v1107_v24 = vsel %vm1105_vm5, %v1315_v9, 0.0  ;;  %vm2491_vm8 = vmmov %vm2487_vm0 }
  0xd5   :  { %v1014_v63 = vsel %vm1013_vm7, %v1011_v17, %v1012_v36  ;;  %v1109_v11 = vrot.slane %v1107_v24, 4  ;;  %v1121_v43 = vsel %vm1105_vm5, %v1317_v35, 0.0  ;;  %v1083_v45 = vadd.f32 %v1082_v59, %v1081_v29  ;;  %vm2495_vm13 = vmmov %vm2487_vm0 }
  0xd6   :  { %vm1106_vm6 = vcmp.eq.s32.totalorder %v2475_v14, %v1014_v63  ;;  %v1084_v15 = vsel %vm2490_vm1, %v1068_v3, 0.0  ;;  %v1123_v62 = vrot.slane %v1121_v43, 4  ;;  %v1135_v44 = vsel %vm1105_vm5, %v1319_v38, 0.0  ;;  %vm2498_vm7 = vmmov %vm2487_vm0 }
  0xd7   :  { %v1108_v54 = vsel %vm1106_vm6, %v1316_v33, 0.0  ;;  %v1122_v61 = vsel %vm1106_vm6, %v1318_v10, 0.0  ;;  %v1110_v28 = vadd.f32 %v1109_v11, %v1107_v24  ;;  %v1136_v31 = vsel %vm1106_vm6, %v1320_v32, 0.0  ;;  %vm2499_vm3 = vmmov %vm2487_vm0 }
  0xd8   :  { %v1115_v5 = vrot.slane %v1108_v54, 4  ;;  %v1129_v0 = vrot.slane %v1122_v61, 4  ;;  %v1098_v56 = vadd.f32 %v1097_v6, %v1096_v2  ;;  %v1124_v46 = vadd.f32 %v1123_v62, %v1121_v43  ;;  %vm2500_vm5 = vmmov %vm2487_vm0 }
  0xd9   :  { %v1137_v48 = vrot.slane %v1135_v44, 4  ;;  %v1099_v49 = vsel %vm2491_vm8, %v1069_v53, 0.0  ;;  %v1111_v30 = vrot.slane %v1110_v28, 2  ;;  %v1143_v34 = vrot.slane %v1136_v31, 4 }
  0xda   :  { %v1116_v26 = vadd.f32 %v1115_v5, %v1108_v54  ;;  %v1130_v47 = vadd.f32 %v1129_v0, %v1122_v61  ;;  %v1086_v16 = vsel %vm2492_vm2, %v1070_v22, 0.0  ;;  %v1125_v50 = vrot.slane %v1124_v46, 2 }
  0xdb   :  { %v1138_v57 = vadd.f32 %v1137_v48, %v1135_v44  ;;  %v1085_v1 = vadd.f32 %v1084_v15, %v1083_v45  ;;  %v1112_v18 = vadd.f32 %v1111_v30, %v1110_v28  ;;  %v1144_v40 = vadd.f32 %v1143_v34, %v1136_v31 }
  0xdc   :  { %v1117_v55 = vrot.slane %v1116_v26, 2  ;;  %v1131_v4 = vrot.slane %v1130_v47, 2  ;;  %v1100_v14 = vadd.f32 %v1099_v49, %v1098_v56  ;;  %v1126_v12 = vadd.f32 %v1125_v50, %v1124_v46 }
  0xdd   :  { %v1139_v41 = vrot.slane %v1138_v57, 2  ;;  %v1101_v25 = vsel %vm2493_vm10, %v1071_v20, 0.0  ;;  %v1113_v42 = vrot.slane %v1112_v18, 1  ;;  %v1145_v17 = vrot.slane %v1144_v40, 2 }
  0xde   :  { %v1118_v21 = vadd.f32 %v1117_v55, %v1116_v26  ;;  %v1132_v23 = vadd.f32 %v1131_v4, %v1130_v47  ;;  %v1088_v27 = vsel %vm2494_vm15, %v1072_v13, 0.0  ;;  %v1127_v39 = vrot.slane %v1126_v12, 1 }
  0xdf   :  { %v1140_v52 = vadd.f32 %v1139_v41, %v1138_v57  ;;  %v1087_v37 = vadd.f32 %v1086_v16, %v1085_v1  ;;  %v1114_v19 = vadd.f32 %v1113_v42, %v1112_v18  ;;  %v1146_v29 = vadd.f32 %v1145_v17, %v1144_v40 }
  0xe0   :  { %v1119_v51 = vrot.slane %v1118_v21, 1  ;;  %v1133_v36 = vrot.slane %v1132_v23, 1  ;;  %v1102_v58 = vadd.f32 %v1101_v25, %v1100_v14  ;;  %v1128_v60 = vadd.f32 %v1127_v39, %v1126_v12 }
  0xe1   :  { %v1141_v2 = vrot.slane %v1140_v52, 1  ;;  %v1103_v63 = vsel %vm2495_vm13, %v1073_v7, 0.0  ;;  %v1147_v53 = vrot.slane %v1146_v29, 1  ;;  %vm1151_vm11 = vcmask 1041408  }
  0xe2   :  { %v1120_v8 = vadd.f32 %v1119_v51, %v1118_v21  ;;  %v1134_v3 = vadd.f32 %v1133_v36, %v1132_v23  ;;  %vm2496_vm14 = vcmask 1040384   ;;  %v1089_v59 = vadd.f32 %v1088_v27, %v1087_v37 }
  0xe3   :  { %v1142_v22 = vadd.f32 %v1141_v2, %v1140_v52  ;;  %v1149_v20 = vsel %vm2496_vm14, %v1114_v19, %v1128_v60  ;;  %vm2497_vm12 = vmmov %vm2496_vm14  ;;  %v1148_v6 = vadd.f32 %v1147_v53, %v1146_v29  ;;  %v1104_v9 = vadd.f32 %v1103_v63, %v1102_v58 }
  0xe4   :  { %v1150_v13 = vsel %vm2497_vm12, %v1120_v8, %v1134_v3 }
  0xe5   :  { %v1152_v24 = vsel %vm1151_vm11, %v1149_v20, %v1142_v22  ;;  %v1153_v33 = vsel %vm1151_vm11, %v1150_v13, %v1148_v6 }
  0xe6   :  { %v2320_v54 = vsub.f32 %v1089_v59, %v1152_v24  ;;  %v1244_v11 = vrot.slane %v1152_v24, 5  ;;  %v2322_v5 = vsub.f32 %v1104_v9, %v1153_v33  ;;  %v1245_v7 = vrot.slane %v1153_v33, 5 }
  0xe8   :  { %v1156_v35 = vmul.f32 %v2320_v54, %v2320_v54  ;;  %v2327_v43 = vsel %vm2498_vm7, %v1089_v59, %v1244_v11  ;;  %v1157_v10 = vmul.f32 %v2322_v5, %v2322_v5  ;;  %v2332_v61 = vsel %vm2499_vm3, %v1104_v9, %v1245_v7 }
  0xea   :  { %v1158_v45 = vsel %vm2487_vm0, %v1156_v35, 0.0  ;;  %v1165_v62 = vsel %vm2500_vm5, %v1157_v10, 0.0  ;;  %vm1268_vm5 = vcmask 1045504  }
  0xeb   :  { %v1159_v15 = vrot.slane %v1158_v45, 4  ;;  %v1166_v0 = vrot.slane %v1165_v62, 4 }
  0xed   :  { %v1160_v28 = vadd.f32 %v1159_v15, %v1158_v45  ;;  %v1167_v26 = vadd.f32 %v1166_v0, %v1165_v62 }
  0xef   :  { %v1161_v38 = vrot.slane %v1160_v28, 2  ;;  %v1168_v44 = vrot.slane %v1167_v26, 2 }
  0xf1   :  { %v1162_v32 = vadd.f32 %v1161_v38, %v1160_v28  ;;  %v1169_v31 = vadd.f32 %v1168_v44, %v1167_v26 }
  0xf3   :  { %v1163_v56 = vrot.slane %v1162_v32, 1  ;;  %v1170_v46 = vrot.slane %v1169_v31, 1 }
  0xf5   :  { %v1164_v47 = vadd.f32 %v1163_v56, %v1162_v32  ;;  %v1171_v48 = vadd.f32 %v1170_v46, %v1169_v31 }
  0xf7   :  { %1307 = vrsqrt.f32 %v1164_v47  ;;  %vm1179_vm6 = vcmp.eq.f32.partialorder %v1164_v47, inf  ;;  %v1182_v12 = vand.u32 2147483648, %v1164_v47  ;;  %vm1181_vm4 = vcmp.eq.f32.partialorder %v1164_v47, 0.0 }
  0xf8   :  { %1309 = vrsqrt.f32 %v1171_v48  ;;  %vm1191_vm9 = vcmp.eq.f32.partialorder %v1171_v48, inf  ;;  %v1194_v25 = vand.u32 2147483648, %v1171_v48  ;;  %vm1193_vm1 = vcmp.eq.f32.partialorder %v1171_v48, 0.0 }
  0xfd   :  { %v1308_v49 = vpop.eup %1307 }
  0xfe   :  { %v1310_v30 = vpop.eup %1309  ;;  %v1173_v55 = vmul.f32 %v1308_v49, %v1164_v47 }
  0xff   :  { %v1185_v34 = vmul.f32 %v1310_v30, %v1171_v48 }
 0x100   :  { %v1174_v16 = vmul.f32 %v1308_v49, %v1173_v55 }
 0x101   :  { %v1186_v50 = vmul.f32 %v1310_v30, %v1185_v34 }
 0x102   :  { %v1175_v4 = vmul.f32 0.5, %v1174_v16 }
 0x103   :  { %v1187_v57 = vmul.f32 0.5, %v1186_v50 }
 0x104   :  { %v1176_v1 = vsub.f32 1.5, %v1175_v4 }
 0x105   :  { %v1188_v18 = vsub.f32 1.5, %v1187_v57 }
 0x106   :  { %v1177_v21 = vmul.f32 %v1308_v49, %v1176_v1 }
 0x107   :  { %v1189_v40 = vmul.f32 %v1310_v30, %v1188_v18 }
 0x108   :  { %v1178_v14 = vmul.f32 %v1177_v21, %v1164_v47 }
 0x109   :  { %v1190_v23 = vmul.f32 %v1189_v40, %v1171_v48 }
 0x10a   :  { %v1180_v41 = vsel %vm1179_vm6, %v1164_v47, %v1178_v14  ;;  %vm1275_vm6 = vcmask 1044480  }
 0x10b   :  { %v2336_v42 = vsel %vm1181_vm4, %v1182_v12, %v1180_v41  ;;  %v1192_v51 = vsel %vm1191_vm9, %v1171_v48, %v1190_v23  ;;  %vm2501_vm4 = vcmask 1040384  }
 0x10c   :  { %v2338_v17 = vsel %vm1193_vm1, %v1194_v25, %v1192_v51  ;;  %vm1196_vm8 = vcmp.gt.f32.partialorder %v2336_v42, 0.0  ;;  %vm2502_vm9 = vmmov %vm2501_vm4 }
 0x10d   :  { %vm1197_vm2 = vcmp.gt.f32.partialorder %v2338_v17, 0.0  ;;  %v1198_v27 = vsel %vm1196_vm8, %v2336_v42, 1.0 }
 0x10e   :  { %v1199_v39 = vsel %vm1197_vm2, %v2338_v17, 1.0  ;;  %1311 = vrcp.f32 %v1198_v27  ;;  %v1211_v29 = vand.u32 2147483648, %v1198_v27  ;;  %v1209_v3 = vand.u32 2147483647, %v1198_v27 }
 0x10f   :  { %1313 = vrcp.f32 %v1199_v39  ;;  %v1225_v2 = vand.u32 2147483648, %v1199_v39  ;;  %v1223_v53 = vand.u32 2147483647, %v1199_v39  ;;  %vm1205_vm13 = vweird.f32 %v1198_v27 }
 0x110   :  { %v1212_v20 = vor.u32 1.1754944e-38, %v1211_v29  ;;  %vm1219_vm12 = vweird.f32 %v1199_v39  ;;  %vm1210_vm7 = vcmp.eq.f32.partialorder %v1209_v3, 8.507059e+37 }
 0x111   :  { %v1226_v6 = vor.u32 1.1754944e-38, %v1225_v2  ;;  %vm1224_vm0 = vcmp.eq.f32.partialorder %v1223_v53, 8.507059e+37 }
 0x114   :  { %v1312_v36 = vpop.eup %1311 }
 0x115   :  { %v1314_v52 = vpop.eup %1313  ;;  %v1201_v37 = vmul.f32 %v1312_v36, %v1198_v27  ;;  %vm1206_vm10 = vweird.f32 %v1312_v36 }
 0x116   :  { %v1215_v19 = vmul.f32 %v1314_v52, %v1199_v39  ;;  %vm1220_vm15 = vweird.f32 %v1314_v52  ;;  %vm1207_vm14 = vmor %vm1205_vm13, %vm1206_vm10 }
 0x117   :  { %v1202_v8 = vsub.f32 1.0, %v1201_v37  ;;  %vm1221_vm3 = vmor %vm1219_vm12, %vm1220_vm15 }
 0x118   :  { %v1216_v58 = vsub.f32 1.0, %v1215_v19 }
 0x119   :  { %v1203_v60 = vmul.f32 %v1312_v36, %v1202_v8 }
 0x11a   :  { %v1217_v63 = vmul.f32 %v1314_v52, %v1216_v58 }
 0x11b   :  { %v1204_v22 = vadd.f32 %v1312_v36, %v1203_v60 }
 0x11c   :  { %v1218_v13 = vadd.f32 %v1314_v52, %v1217_v63 }
 0x11d   :  { %v1208_v59 = vsel %vm1207_vm14, %v1312_v36, %v1204_v22 }
 0x11e   :  { %v1213_v9 = vsel %vm1210_vm7, %v1212_v20, %v1208_v59  ;;  %v1222_v24 = vsel %vm1221_vm3, %v1314_v52, %v1218_v13 }
 0x11f   :  { %v1227_v33 = vsel %vm1224_vm0, %v1226_v6, %v1222_v24  ;;  %v1228_v11 = vmul.f32 %v1213_v9, %v2320_v54 }
 0x120   :  { %v1229_v7 = vmul.f32 %v1227_v33, %v2322_v5 }
 0x121   :  { %v1230_v35 = vperm.slane %v1228_v11, 0  ;;  %v1234_v10 = vperm.slane %v1228_v11, 1  ;;  %v1238_v45 = vperm.slane %v1228_v11, 2  ;;  %v1250_v15 = vrot.slane %v1228_v11, 2 }
 0x122   :  { %v1231_v62 = vperm.slane %v1229_v7, 0  ;;  %v1235_v0 = vperm.slane %v1229_v7, 1  ;;  %v1239_v28 = vperm.slane %v1229_v7, 2  ;;  %v1251_v26 = vrot.slane %v1229_v7, 2 }
 0x123   :  { %v1232_v38 = vmul.f32 %v1230_v35, %v1228_v11  ;;  %v1236_v44 = vmul.f32 %v1234_v10, %v1228_v11  ;;  %v1240_v32 = vmul.f32 %v1238_v45, %v1228_v11  ;;  %v1269_v31 = vsel %vm1268_vm5, %v2327_v43, %v1250_v15 }
 0x124   :  { %v1233_v56 = vmul.f32 %v1231_v62, %v1229_v7  ;;  %v1237_v46 = vmul.f32 %v1235_v0, %v1229_v7  ;;  %v1241_v54 = vmul.f32 %v1239_v28, %v1229_v7  ;;  %v1270_v5 = vsel %vm1268_vm5, %v2332_v61, %v1251_v26  ;;  %1278 = vst [vmem:[#allocation2] sm:$0xff] %v1269_v31 }
 0x125   :  { %v1256_v47 = vrot.slane %v1232_v38, 6  ;;  %v1262_v48 = vrot.slane %v1236_v44, 3  ;;  %1279 = vst [vmem:[#allocation2 + $0x8] sm:$0xff] %v1270_v5  ;;  %v1271_v43 = vsel %vm2501_vm4, %v1250_v15, %v2336_v42  ;;  %v1272_v61 = vsel %vm2502_vm9, %v1251_v26, %v2338_v17 }
 0x126   :  { %v1257_v49 = vrot.slane %v1233_v56, 6  ;;  %v1263_v30 = vrot.slane %v1237_v46, 3  ;;  %1282 = vst [vmem:[#allocation2 + $0x20] sm:$0x7] %v1240_v32 }
 0x127   :  { %v1273_v55 = vsel %vm1151_vm11, %v1271_v43, %v1256_v47  ;;  %1283 = vst [vmem:[#allocation2 + $0x28] sm:$0x7] %v1241_v54 }
 0x128   :  { %v1274_v34 = vsel %vm1151_vm11, %v1272_v61, %v1257_v49  ;;  %v1276_v16 = vsel %vm1275_vm6, %v1273_v55, %v1262_v48 }
 0x129   :  { %v1277_v50 = vsel %vm1275_vm6, %v1274_v34, %v1263_v30  ;;  %1280 = vst [vmem:[#allocation2 + $0x10] sm:$0xff] %v1276_v16 }
 0x12a   :  { %1281 = vst [vmem:[#allocation2 + $0x18] sm:$0xff] %v1277_v50 }
 0x12b   :  { %1296 = dma.vmem_to_hbm [thread:$0]  %s1289_s30, 768, %s1291_s6, [#allocation3], %s1350_s4, %s1350_s4, %s1351_s7  }
 0x12c   :  { %1345 = dma.done.wait [#allocation3], 768  }
 0x12d   :  { %1346 = vsyncadd [#allocation3], 4294966528 }
 0x12e   :  { %1301 = vsyncpa [#allocation3], 1 }

</bundles_post_ra>
